<compile_context>
chip_gen: v5e
topology: v5e:2x2
jax: 0.10.0
libtpu: 0.0.40
codegen_flags: <defaults>
</compile_context>

<pallas_src>
import functools

import jax
import jax.numpy as jnp
from jax.experimental import pallas as pl
from jax.experimental.pallas import tpu as pltpu

_LANE = 128
_SINGLE_TILE_MAX = 1024   # up to this batch: one grid step, block == full array
_MXU_FC1_MIN_TB = 512     # at/above this tile size fc1 runs on the MXU


def _net_kernel(x_ref, w1_ref, b1_ref, w2_ref, b2_ref, o_ref, *,
                num_actions, fc1_on_mxu):
    TB, S = x_ref.shape
    A_pad = o_ref.shape[1]

    x = x_ref[...]                                    # (TB, S) f32

    # ---- fc1 + ReLU -------------------------------------------------------
    if fc1_on_mxu:
        # Large tiles: an MXU pass costs ~TB/8 pushes regardless of K, so this
        # rebalances work off the VALU slot (which the rank-1 unroll saturates).
        h = jnp.dot(x, w1_ref[...], preferred_element_type=jnp.float32) + b1_ref[...]
    else:
        # Small tiles: K = S (= 4) is far too shallow for the MXU; S rank-1
        # VPU updates (vmul + vadd) beat an MXU push/pop.
        w1 = w1_ref[...]
        h = b1_ref[...]                               # (1, H) broadcasts to (TB, H)
        for k in range(S):                            # static unroll (S known at trace)
            h = h + x[:, k:k + 1] * w1[k:k + 1, :]
    h = jnp.maximum(h, 0.0)

    # ---- fc2 on the MXU: bf16 weights, f32 accumulation --------------------
    logits = jnp.dot(h.astype(jnp.bfloat16), w2_ref[...],
                     preferred_element_type=jnp.float32) + b2_ref[...]    # (TB, A_pad)

    # ---- softmax ------------------------------------------------------------
    if num_actions == 2:
        # prepare_params folded fc2 to the logit difference l0 - l1 and
        # broadcast it across every lane, so softmax collapses to a sigmoid:
        # EUP exp + divide, no cross-lane (XLU) max/sum reductions.
        p0 = 1.0 / (1.0 + jnp.exp(-logits))           # exact: p0 + (1 - p0) == 1
        lane = jax.lax.broadcasted_iota(jnp.int32, (TB, A_pad), 1)
        out = jnp.where(lane == 0, p0, 1.0 - p0)      # lanes >= 2 are garbage, sliced off
    else:
        # Generic path: padded lanes carry a -1e30 bias so exp() == 0 there and
        # the lane-wide softmax is exact over the real classes.
        m = jnp.max(logits, axis=-1, keepdims=True)
        e = jnp.exp(logits - m)
        out = e / jnp.sum(e, axis=-1, keepdims=True)  # exact divide: rows sum to 1

    o_ref[...] = out.astype(o_ref.dtype)


def prepare_params(w1, b1, w2, b2):
    """One-time weight prep (hoisted out of the per-step forward).

    - w2 / b2 are lane-padded to 128 (lane-dense output store) and w2 cast to bf16.
    - For 2 actions, fc2 is folded to the logit difference l0 - l1, broadcast
      across all 128 lanes, so the kernel's softmax collapses to a sigmoid.
    """
    H, A = w2.shape
    A_pad = pl.cdiv(A, _LANE) * _LANE
    w1f = w1.astype(jnp.float32)
    b1f = b1.reshape(1, -1).astype(jnp.float32)
    if A == 2:
        d = (w2[:, 0] - w2[:, 1]).astype(jnp.float32)                 # (H,)
        db = (b2.reshape(-1)[0] - b2.reshape(-1)[1]).astype(jnp.float32)
        w2k = jnp.broadcast_to(d[:, None], (H, A_pad)).astype(jnp.bfloat16)
        b2k = jnp.full((1, A_pad), db, jnp.float32)
    else:
        w2k = jnp.zeros((H, A_pad), jnp.bfloat16).at[:, :A].set(w2.astype(jnp.bfloat16))
        b2k = jnp.full((1, A_pad), -1e30, jnp.float32).at[:, :A].set(
            b2.reshape(1, -1).astype(jnp.float32))
    return (w1f, b1f, w2k, b2k)


@functools.partial(jax.jit, static_argnames=("num_actions", "block_b"))
def net_forward(state, params, num_actions, *, block_b=1024):
    """state: (B, S) f32; params: output of prepare_params(); returns (B, A) f32."""
    w1, b1, w2k, b2k = params
    B, S = state.shape
    H = w1.shape[1]
    A_pad = w2k.shape[1]

    if B <= _SINGLE_TILE_MAX:
        # Single tile: block == full array (exempt from the (8,128) rule), so
        # no input padding and no per-grid-step overhead.
        TB, nb = B, 1
        xp = state
    else:
        TB = block_b
        nb = pl.cdiv(B, TB)
        Bp = nb * TB
        xp = state if Bp == B else jnp.pad(state, ((0, Bp - B), (0, 0)))

    fc1_on_mxu = TB >= _MXU_FC1_MIN_TB

    kernel = functools.partial(_net_kernel, num_actions=num_actions,
                               fc1_on_mxu=fc1_on_mxu)
    out = pl.pallas_call(
        kernel,
        out_shape=jax.ShapeDtypeStruct((nb * TB, A_pad), jnp.bfloat16),
        grid=(nb,),
        in_specs=[
            pl.BlockSpec((TB, S), lambda i: (i, 0)),
            pl.BlockSpec((S, H), lambda i: (0, 0)),
            pl.BlockSpec((1, H), lambda i: (0, 0)),
            pl.BlockSpec((H, A_pad), lambda i: (0, 0)),
            pl.BlockSpec((1, A_pad), lambda i: (0, 0)),
        ],
        out_specs=pl.BlockSpec((TB, A_pad), lambda i: (i, 0)),
        # "parallel" only pays off on v7x when nb >= 4 (>= 2 steps per TC); it
        # is harmless (identical codegen) for the single-tile / small-nb case.
        compiler_params=pltpu.CompilerParams(dimension_semantics=("parallel",)),
    )(xp, w1, b1, w2k, b2k)
    return out[:B, :num_actions].astype(jnp.float32)


def init_params(key, state_space, hidden, action_space):
    # Deterministic init mimicking nn.Linear's uniform(-1/sqrt(fan_in), 1/sqrt(fan_in))
    k1, k2, k3, k4 = jax.random.split(key, 4)
    bound1 = 1.0 / jnp.sqrt(jnp.float32(state_space))
    bound2 = 1.0 / jnp.sqrt(jnp.float32(hidden))
    w1 = jax.random.uniform(k1, (state_space, hidden), jnp.float32, -bound1, bound1)
    b1 = jax.random.uniform(k2, (1, hidden), jnp.float32, -bound1, bound1)
    w2 = jax.random.uniform(k3, (hidden, action_space), jnp.float32, -bound2, bound2)
    b2 = jax.random.uniform(k4, (1, action_space), jnp.float32, -bound2, bound2)
    return w1, b1, w2, b2


def _reference(state, w1, b1, w2, b2):
    hi = jax.lax.Precision.HIGHEST  # keep the reference itself in true f32
    h = jnp.maximum(jnp.dot(state, w1, precision=hi) + b1, 0.0)
    logits = jnp.dot(h, w2, precision=hi) + b2
    return jax.nn.softmax(logits, axis=1)


if __name__ == "__main__":
    # Policy-gradient net for a CartPole-like env: state_space=4, action_space=2
    STATE_SPACE = 4
    HIDDEN = 128
    ACTION_SPACE = 2
    BATCH = 256          # batch many rollout states per call (amortizes launch cost)

    key = jax.random.PRNGKey(0)
    k_params, k_state, k_small, k_big = jax.random.split(key, 4)
    w1, b1, w2, b2 = init_params(k_params, STATE_SPACE, HIDDEN, ACTION_SPACE)
    params = prepare_params(w1, b1, w2, b2)   # one-time weight prep (hoisted out of forward)

    # main batch: single tile, VPU fc1
    state = jax.random.normal(k_state, (BATCH, STATE_SPACE), jnp.float32)
    out = jax.block_until_ready(net_forward(state, params, num_actions=ACTION_SPACE))
    ref = _reference(state, w1, b1, w2, b2)
    assert out.shape == (BATCH, ACTION_SPACE)
    # fc2 runs in bf16 on the MXU and the output is stored as bf16, so allow
    # bf16-level error vs the f32 reference.
    assert jnp.allclose(out, ref, atol=2e-2, rtol=0.0), float(jnp.max(jnp.abs(out - ref)))
    assert jnp.allclose(jnp.sum(out, axis=1), 1.0, atol=1e-2)

    # small, non-multiple-of-8 batch: single tile, block == full array, no padding
    small = jax.random.normal(k_small, (24, STATE_SPACE), jnp.float32)
    out_s = jax.block_until_ready(net_forward(small, params, num_actions=ACTION_SPACE))
    ref_s = _reference(small, w1, b1, w2, b2)
    assert out_s.shape == (24, ACTION_SPACE)
    assert jnp.allclose(out_s, ref_s, atol=2e-2, rtol=0.0)

    # large rollout batch: tiled grid (TB=1024, 3 steps -> pipelining engages),
    # fc1 on the MXU, ragged tail padded once under jit
    big = jax.random.normal(k_big, (2500, STATE_SPACE), jnp.float32)
    out_b = jax.block_until_ready(net_forward(big, params, num_actions=ACTION_SPACE))
    ref_b = _reference(big, w1, b1, w2, b2)
    assert out_b.shape == (2500, ACTION_SPACE)
    assert jnp.allclose(out_b, ref_b, atol=2e-2, rtol=0.0)
    assert jnp.allclose(jnp.sum(out_b, axis=1), 1.0, atol=1e-2)

    print("KERNEL_OK")
</pallas_src>

<mosaic_0001>
module attributes {stable_mosaic.version = 11 : i64} {
  func.func @_net_kernel(%arg0: i32, %arg1: memref<256x4xf32, #tpu.memory_space<vmem>>, %arg2: memref<4x128xf32, #tpu.memory_space<vmem>>, %arg3: memref<1x128xf32, #tpu.memory_space<vmem>>, %arg4: memref<128x128xbf16, #tpu.memory_space<vmem>>, %arg5: memref<1x128xf32, #tpu.memory_space<vmem>>, %arg6: memref<256x128xbf16, #tpu.memory_space<vmem>>) attributes {dimension_semantics = [#tpu.dimension_semantics<parallel>], iteration_bounds = array<i64: 1>, scalar_prefetch = 0 : i64, scratch_operands = 0 : i64, tpu.core_type = #tpu.core_type<tc>, window_params = [{transform_indices = @transform_0, window_bounds = array<i64: 256, 4>}, {pipeline_mode = #tpu.pipeline_mode<synchronous>, transform_indices = @transform_1, window_bounds = array<i64: 4, 128>}, {pipeline_mode = #tpu.pipeline_mode<synchronous>, transform_indices = @transform_2, window_bounds = array<i64: 1, 128>}, {pipeline_mode = #tpu.pipeline_mode<synchronous>, transform_indices = @transform_3, window_bounds = array<i64: 128, 128>}, {pipeline_mode = #tpu.pipeline_mode<synchronous>, transform_indices = @transform_4, window_bounds = array<i64: 1, 128>}, {transform_indices = @transform_5, window_bounds = array<i64: 256, 128>}]} {
    %c0 = arith.constant 0 : index
    %c0_0 = arith.constant 0 : index
    %0 = vector.load %arg1[%c0, %c0_0] : memref<256x4xf32, #tpu.memory_space<vmem>>, vector<256x4xf32>
    %c0_1 = arith.constant 0 : index
    %c0_2 = arith.constant 0 : index
    %1 = vector.load %arg2[%c0_1, %c0_2] : memref<4x128xf32, #tpu.memory_space<vmem>>, vector<4x128xf32>
    %c0_3 = arith.constant 0 : index
    %c0_4 = arith.constant 0 : index
    %2 = vector.load %arg3[%c0_3, %c0_4] : memref<1x128xf32, #tpu.memory_space<vmem>>, vector<1x128xf32>
    %3 = vector.extract_strided_slice %0 {offsets = [0, 0], sizes = [256, 1], strides = [1, 1]} : vector<256x4xf32> to vector<256x1xf32>
    %4 = vector.extract_strided_slice %1 {offsets = [0, 0], sizes = [1, 128], strides = [1, 1]} : vector<4x128xf32> to vector<1x128xf32>
    %5 = vector.broadcast %3 : vector<256x1xf32> to vector<256x128xf32>
    %6 = vector.broadcast %4 : vector<1x128xf32> to vector<256x128xf32>
    %7 = arith.mulf %5, %6 : vector<256x128xf32>
    %8 = vector.broadcast %2 : vector<1x128xf32> to vector<256x128xf32>
    %9 = arith.addf %8, %7 : vector<256x128xf32>
    %10 = vector.extract_strided_slice %0 {offsets = [0, 1], sizes = [256, 1], strides = [1, 1]} : vector<256x4xf32> to vector<256x1xf32>
    %11 = vector.extract_strided_slice %1 {offsets = [1, 0], sizes = [1, 128], strides = [1, 1]} : vector<4x128xf32> to vector<1x128xf32>
    %12 = vector.broadcast %10 : vector<256x1xf32> to vector<256x128xf32>
    %13 = vector.broadcast %11 : vector<1x128xf32> to vector<256x128xf32>
    %14 = arith.mulf %12, %13 : vector<256x128xf32>
    %15 = arith.addf %9, %14 : vector<256x128xf32>
    %16 = vector.extract_strided_slice %0 {offsets = [0, 2], sizes = [256, 1], strides = [1, 1]} : vector<256x4xf32> to vector<256x1xf32>
    %17 = vector.extract_strided_slice %1 {offsets = [2, 0], sizes = [1, 128], strides = [1, 1]} : vector<4x128xf32> to vector<1x128xf32>
    %18 = vector.broadcast %16 : vector<256x1xf32> to vector<256x128xf32>
    %19 = vector.broadcast %17 : vector<1x128xf32> to vector<256x128xf32>
    %20 = arith.mulf %18, %19 : vector<256x128xf32>
    %21 = arith.addf %15, %20 : vector<256x128xf32>
    %22 = vector.extract_strided_slice %0 {offsets = [0, 3], sizes = [256, 1], strides = [1, 1]} : vector<256x4xf32> to vector<256x1xf32>
    %23 = vector.extract_strided_slice %1 {offsets = [3, 0], sizes = [1, 128], strides = [1, 1]} : vector<4x128xf32> to vector<1x128xf32>
    %24 = vector.broadcast %22 : vector<256x1xf32> to vector<256x128xf32>
    %25 = vector.broadcast %23 : vector<1x128xf32> to vector<256x128xf32>
    %26 = arith.mulf %24, %25 : vector<256x128xf32>
    %27 = arith.addf %21, %26 : vector<256x128xf32>
    %cst = arith.constant 0.000000e+00 : f32
    %28 = vector.broadcast %cst : f32 to vector<256x128xf32>
    %29 = arith.maximumf %27, %28 : vector<256x128xf32>
    %30 = arith.truncf %29 : vector<256x128xf32> to vector<256x128xbf16>
    %c0_5 = arith.constant 0 : index
    %c0_6 = arith.constant 0 : index
    %31 = vector.load %arg4[%c0_5, %c0_6] : memref<128x128xbf16, #tpu.memory_space<vmem>>, vector<128x128xbf16>
    %cst_7 = arith.constant dense<0.000000e+00> : vector<256x128xf32>
    %32 = tpu.matmul %30, %31, %cst_7 {dimension_numbers = #tpu.dot_dimension_numbers<[1], [0], [0], [1], [0, 0, 1, 1], [], []>} : vector<256x128xbf16>, vector<128x128xbf16>, vector<256x128xf32> -> vector<256x128xf32>
    %c0_8 = arith.constant 0 : index
    %c0_9 = arith.constant 0 : index
    %33 = vector.load %arg5[%c0_8, %c0_9] : memref<1x128xf32, #tpu.memory_space<vmem>>, vector<1x128xf32>
    %34 = vector.broadcast %33 : vector<1x128xf32> to vector<256x128xf32>
    %35 = arith.addf %32, %34 : vector<256x128xf32>
    %cst_10 = arith.constant 0.000000e+00 : f32
    %36 = vector.broadcast %cst_10 : f32 to vector<256x128xf32>
    %37 = arith.subf %36, %35 : vector<256x128xf32>
    %38 = math.exp %37 : vector<256x128xf32>
    %cst_11 = arith.constant 1.000000e+00 : f32
    %39 = vector.broadcast %cst_11 : f32 to vector<256x128xf32>
    %40 = arith.addf %39, %38 : vector<256x128xf32>
    %cst_12 = arith.constant 1.000000e+00 : f32
    %41 = vector.broadcast %cst_12 : f32 to vector<256x128xf32>
    %42 = arith.divf %41, %40 : vector<256x128xf32>
    %43 = tpu.iota {dimensions = array<i32: 1>} : vector<256x128xi32>
    %c0_i32 = arith.constant 0 : i32
    %44 = vector.broadcast %c0_i32 : i32 to vector<256x128xi32>
    %45 = arith.cmpi eq, %43, %44 : vector<256x128xi32>
    %cst_13 = arith.constant 1.000000e+00 : f32
    %46 = vector.broadcast %cst_13 : f32 to vector<256x128xf32>
    %47 = arith.subf %46, %42 : vector<256x128xf32>
    %48 = arith.select %45, %42, %47 : vector<256x128xi1>, vector<256x128xf32>
    %49 = arith.truncf %48 : vector<256x128xf32> to vector<256x128xbf16>
    %c0_14 = arith.constant 0 : index
    %c0_15 = arith.constant 0 : index
    %50 = vector.load %arg6[%c0_14, %c0_15] : memref<256x128xbf16, #tpu.memory_space<vmem>>, vector<256x128xbf16>
    tpu.vector_store %arg6[%c0_14, %c0_15], %49 {strides = array<i32>} : memref<256x128xbf16, #tpu.memory_space<vmem>>, vector<256x128xbf16>,
    return
  }
  func.func @transform_0(%arg0: i32) -> (i32, i32) {
    %c0_i32 = arith.constant 0 : i32
    %c0_i32_0 = arith.constant 0 : i32
    return %arg0, %c0_i32 : i32, i32
  }
  func.func @transform_1(%arg0: i32) -> (i32, i32) {
    %c0_i32 = arith.constant 0 : i32
    %c0_i32_0 = arith.constant 0 : i32
    %c0_i32_1 = arith.constant 0 : i32
    return %c0_i32, %c0_i32_0 : i32, i32
  }
  func.func @transform_2(%arg0: i32) -> (i32, i32) {
    %c0_i32 = arith.constant 0 : i32
    %c0_i32_0 = arith.constant 0 : i32
    %c0_i32_1 = arith.constant 0 : i32
    return %c0_i32, %c0_i32_0 : i32, i32
  }
  func.func @transform_3(%arg0: i32) -> (i32, i32) {
    %c0_i32 = arith.constant 0 : i32
    %c0_i32_0 = arith.constant 0 : i32
    %c0_i32_1 = arith.constant 0 : i32
    return %c0_i32, %c0_i32_0 : i32, i32
  }
  func.func @transform_4(%arg0: i32) -> (i32, i32) {
    %c0_i32 = arith.constant 0 : i32
    %c0_i32_0 = arith.constant 0 : i32
    %c0_i32_1 = arith.constant 0 : i32
    return %c0_i32, %c0_i32_0 : i32, i32
  }
  func.func @transform_5(%arg0: i32) -> (i32, i32) {
    %c0_i32 = arith.constant 0 : i32
    %c0_i32_0 = arith.constant 0 : i32
    return %arg0, %c0_i32 : i32, i32
  }
}

</mosaic_0001>

<bundles_post_ra>
// kernel: net_forward.1
= control target key start
LH: loop header
LB: loop body
LE: loop exit
PB: predicated region body
PF: predicated region fallthrough
CT: control target
= control target key end

     0   :  { %v2128_v0 = vmov 0   ;;  %v2129_v33 = vmov 1   ;;  %v3557_v62 = vmov 2   ;;  %s3545_s0 = inlined_call_operand.vmem [shape: f32[256,4], index: 0, kind: input, shape index: {}]   ;;  %s3546_s2 = inlined_call_operand.vmem [shape: f32[1,128], index: 2, kind: input, shape index: {}]   ;;  %s3547_s1 = inlined_call_operand.vmem [shape: f32[4,128], index: 1, kind: input, shape index: {}]   ;;  %s3548_s3 = inlined_call_operand.vmem [shape: bf16[128,128], index: 3, kind: input, shape index: {}]   ;;  %s3549_s4 = inlined_call_operand.vmem [shape: f32[1,128], index: 4, kind: input, shape index: {}]   ;;  %s3550_s5 = inlined_call_operand.vmem [shape: bf16[256,128], index: 5, kind: output, shape index: {}]  }
   0x1   :  { %1974 = vset.pattern.permute.xlu2 %v2128_v0  ;;  %1973 = vset.pattern.permute.xlu1 %v2128_v0  ;;  %v2165_v1 = vld [vmem:[%s3545_s0 + $0x20] sm:$0xff]  ;;  %v2170_v2 = vld [vmem:[%s3545_s0 + $0x10] sm:$0xff]  ;;  %v2183_v4 = vld [vmem:[%s3545_s0 + $0x28] sm:$0xff] }
   0x2   :  { %3576 = vst [vmem:[#allocation2_spill] sm:$0xff] %v2165_v1  ;;  %v2175_v3 = vld [vmem:[%s3545_s0] sm:$0xff]  ;;  %1972 = vset.pattern.permute.xlu0 %v2128_v0  ;;  %76 = vperm.xlu2 %1974, %v2165_v1   ;;  %v2188_v5 = vld [vmem:[%s3545_s0 + $0x18] sm:$0xff]  ;;  %v2193_v6 = vld [vmem:[%s3545_s0 + $0x8] sm:$0xff]  ;;  %v3561_v0 = vmov 3  }
   0x3   :  { %3577 = vst [vmem:[#allocation3_spill] sm:$0xff] %v2170_v2  ;;  %66 = vperm.xlu1 %1973, %v2170_v2   ;;  %56 = vperm.xlu0 %1972, %v2175_v3   ;;  %v2201_v7 = vld [vmem:[%s3545_s0 + $0x40] sm:$0xff]  ;;  %v2206_v8 = vld [vmem:[%s3545_s0 + $0x38] sm:$0xff]  ;;  %v2211_v9 = vld [vmem:[%s3545_s0 + $0x30] sm:$0xff] }
   0x4   :  { %3578 = vst [vmem:[#allocation4_spill] sm:$0xff] %v2183_v4  ;;  %v2219_v10 = vld [vmem:[%s3545_s0 + $0x58] sm:$0xff]  ;;  %v2224_v11 = vld [vmem:[%s3545_s0 + $0x50] sm:$0xff]  ;;  %v2229_v12 = vld [vmem:[%s3545_s0 + $0x48] sm:$0xff] }
   0x5   :  { %3579 = vst [vmem:[#allocation5_spill] sm:$0xff] %v2188_v5  ;;  %v2237_v13 = vld [vmem:[%s3545_s0 + $0x70] sm:$0xff]  ;;  %v2242_v14 = vld [vmem:[%s3545_s0 + $0x68] sm:$0xff]  ;;  %v2247_v15 = vld [vmem:[%s3545_s0 + $0x60] sm:$0xff] }
   0x6   :  { %3580 = vst [vmem:[#allocation6_spill] sm:$0xff] %v2206_v8  ;;  %v2255_v16 = vld [vmem:[%s3545_s0 + $0x88] sm:$0xff]  ;;  %v2260_v17 = vld [vmem:[%s3545_s0 + $0x80] sm:$0xff]  ;;  %v2265_v18 = vld [vmem:[%s3545_s0 + $0x78] sm:$0xff] }
   0x7   :  { %3581 = vst [vmem:[#allocation7_spill] sm:$0xff] %v2224_v11  ;;  %v2273_v19 = vld [vmem:[%s3545_s0 + $0xa0] sm:$0xff]  ;;  %v2278_v20 = vld [vmem:[%s3545_s0 + $0x98] sm:$0xff]  ;;  %v2283_v21 = vld [vmem:[%s3545_s0 + $0x90] sm:$0xff] }
   0x8   :  { %3582 = vst [vmem:[#allocation8_spill] sm:$0xff] %v2273_v19  ;;  %v2291_v22 = vld [vmem:[%s3545_s0 + $0xb8] sm:$0xff]  ;;  %v2296_v23 = vld [vmem:[%s3545_s0 + $0xb0] sm:$0xff]  ;;  %v2301_v24 = vld [vmem:[%s3545_s0 + $0xa8] sm:$0xff] }
   0x9   :  { %3583 = vst [vmem:[#allocation9_spill] sm:$0xff] %v2291_v22  ;;  %v2309_v25 = vld [vmem:[%s3545_s0 + $0xd0] sm:$0xff]  ;;  %v2314_v26 = vld [vmem:[%s3545_s0 + $0xc8] sm:$0xff]  ;;  %v2319_v27 = vld [vmem:[%s3545_s0 + $0xc0] sm:$0xff] }
   0xa   :  { %81 = vperm.xlu2 %1974, %v2183_v4   ;;  %3584 = vst [vmem:[#allocation10_spill] sm:$0xff] %v2296_v23  ;;  %v2327_v28 = vld [vmem:[%s3545_s0 + $0xe8] sm:$0xff]  ;;  %v2332_v29 = vld [vmem:[%s3545_s0 + $0xe0] sm:$0xff]  ;;  %v2337_v30 = vld [vmem:[%s3545_s0 + $0xd8] sm:$0xff] }
   0xb   :  { %71 = vperm.xlu1 %1973, %v2188_v5   ;;  %61 = vperm.xlu0 %1972, %v2193_v6   ;;  %3585 = vst [vmem:[#allocation11_spill] sm:$0xff] %v2301_v24  ;;  %v2345_v31 = vld [vmem:[%s3545_s0 + $0xf8] sm:$0xff]  ;;  %v2350_v32 = vld [vmem:[%s3545_s0 + $0xf0] sm:$0xff]  ;;  %v2423_v55 = vld [vmem:[%s3547_s1] sm:$0xf] }
   0xc   :  { %3586 = vst [vmem:[#allocation12_spill] sm:$0xff] %v2327_v28  ;;  %v2435_v59 = vperm.slane %v2423_v55, 0  ;;  %v2441_v61 = vld [vmem:[%s3546_s2] ss:$0 sm:$0xff] }
   0xd   :  { %3587 = vst [vmem:[#allocation13_spill] sm:$0xff] %v2332_v29 }
   0xe   :  { %3588 = vst [vmem:[#allocation14_spill] sm:$0xff] %v2345_v31 }
   0xf   :  { %3589 = vst [vmem:[#allocation15_spill] sm:$0xff] %v2350_v32 }
  0x12   :  { %96 = vperm.xlu2 %1974, %v2201_v7  }
  0x13   :  { %91 = vperm.xlu1 %1973, %v2206_v8   ;;  %86 = vperm.xlu0 %1972, %v2211_v9  }
  0x1a   :  { %111 = vperm.xlu2 %1974, %v2219_v10  }
  0x1b   :  { %106 = vperm.xlu1 %1973, %v2224_v11   ;;  %101 = vperm.xlu0 %1972, %v2229_v12  }
  0x22   :  { %126 = vperm.xlu2 %1974, %v2237_v13  }
  0x23   :  { %121 = vperm.xlu1 %1973, %v2242_v14   ;;  %116 = vperm.xlu0 %1972, %v2247_v15  }
  0x2a   :  { %141 = vperm.xlu2 %1974, %v2255_v16  }
  0x2b   :  { %136 = vperm.xlu1 %1973, %v2260_v17   ;;  %131 = vperm.xlu0 %1972, %v2265_v18  }
  0x32   :  { %156 = vperm.xlu2 %1974, %v2273_v19  }
  0x33   :  { %151 = vperm.xlu1 %1973, %v2278_v20   ;;  %146 = vperm.xlu0 %1972, %v2283_v21  }
  0x3a   :  { %171 = vperm.xlu2 %1974, %v2291_v22  }
  0x3b   :  { %166 = vperm.xlu1 %1973, %v2296_v23   ;;  %161 = vperm.xlu0 %1972, %v2301_v24  }
  0x42   :  { %186 = vperm.xlu2 %1974, %v2309_v25  }
  0x43   :  { %181 = vperm.xlu1 %1973, %v2314_v26   ;;  %176 = vperm.xlu0 %1972, %v2319_v27  }
  0x4a   :  { %201 = vperm.xlu2 %1974, %v2327_v28  }
  0x4b   :  { %196 = vperm.xlu1 %1973, %v2332_v29   ;;  %191 = vperm.xlu0 %1972, %v2337_v30  }
  0x52   :  { %1975 = vset.pattern.permute.xlu2 %v2129_v33 }
  0x53   :  { %211 = vperm.xlu1 %1973, %v2345_v31   ;;  %206 = vperm.xlu0 %1972, %v2350_v32  }
  0x54   :  { %283 = vperm.xlu2 %1975, %v2175_v3  }
  0x5b   :  { %1977 = vset.pattern.permute.xlu1 %v2129_v33  ;;  %1976 = vset.pattern.permute.xlu0 %v2129_v33 }
  0x5c   :  { %291 = vperm.xlu1 %1977, %v2170_v2   ;;  %295 = vperm.xlu2 %1975, %v2188_v5   ;;  %v2357_v34 = vpop.permute.xlu2 %76 }
  0x5d   :  { %287 = vperm.xlu0 %1976, %v2193_v6  }
  0x64   :  { %299 = vperm.xlu1 %1977, %v2165_v1   ;;  %303 = vperm.xlu2 %1975, %v2183_v4   ;;  %v2362_v35 = vpop.permute.xlu2 %81 }
  0x65   :  { %307 = vperm.xlu0 %1976, %v2211_v9  }
  0x6c   :  { %311 = vperm.xlu1 %1977, %v2206_v8   ;;  %315 = vperm.xlu2 %1975, %v2201_v7   ;;  %v2367_v36 = vpop.permute.xlu2 %96 }
  0x6d   :  { %319 = vperm.xlu0 %1976, %v2229_v12  }
  0x74   :  { %323 = vperm.xlu1 %1977, %v2224_v11   ;;  %327 = vperm.xlu2 %1975, %v2219_v10   ;;  %v2372_v37 = vpop.permute.xlu2 %111 }
  0x75   :  { %331 = vperm.xlu0 %1976, %v2247_v15   ;;  %v2375_v38 = vpop.permute.xlu1 %66  ;;  %v57_v39 = vpop.permute.xlu0 %56 }
  0x76   :  { %v215_v60 = vmul.f32 %v2435_v59, %v57_v39 }
  0x78   :  { %v250_v63 = vadd.f32 %v2441_v61, %v215_v60 }
  0x7c   :  { %335 = vperm.xlu1 %1977, %v2242_v14   ;;  %339 = vperm.xlu2 %1975, %v2237_v13   ;;  %v2379_v40 = vpop.permute.xlu2 %126 }
  0x7d   :  { %343 = vperm.xlu0 %1976, %v2265_v18   ;;  %v72_v41 = vpop.permute.xlu1 %71  ;;  %v2382_v42 = vpop.permute.xlu0 %61 }
  0x7e   :  { %v218_v60 = vmul.f32 %v2435_v59, %v72_v41  ;;  %v220_v41 = vmul.f32 %v2435_v59, %v2362_v35  ;;  %v223_v35 = vmul.f32 %v2435_v59, %v2367_v36  ;;  %v226_v36 = vmul.f32 %v2435_v59, %v2372_v37 }
  0x84   :  { %347 = vperm.xlu1 %1977, %v2260_v17   ;;  %351 = vperm.xlu2 %1975, %v2255_v16   ;;  %v2386_v43 = vpop.permute.xlu2 %141 }
  0x85   :  { %355 = vperm.xlu0 %1976, %v2283_v21   ;;  %v2389_v44 = vpop.permute.xlu1 %91  ;;  %v2391_v45 = vpop.permute.xlu0 %86 }
  0x8c   :  { %359 = vperm.xlu1 %1977, %v2278_v20   ;;  %363 = vperm.xlu2 %1975, %v2273_v19   ;;  %v2395_v46 = vpop.permute.xlu2 %156  ;;  %v3590_v19 = vmov 2  }
  0x8d   :  { %367 = vperm.xlu0 %1976, %v2301_v24   ;;  %v2398_v47 = vpop.permute.xlu1 %106  ;;  %v2400_v48 = vpop.permute.xlu0 %101 }
  0x94   :  { %371 = vperm.xlu1 %1977, %v2296_v23   ;;  %375 = vperm.xlu2 %1975, %v2291_v22   ;;  %v2404_v49 = vpop.permute.xlu2 %171 }
  0x95   :  { %379 = vperm.xlu0 %1976, %v2319_v27   ;;  %v2407_v50 = vpop.permute.xlu1 %121  ;;  %v2409_v51 = vpop.permute.xlu0 %116 }
  0x9c   :  { %383 = vperm.xlu1 %1977, %v2314_v26   ;;  %387 = vperm.xlu2 %1975, %v2309_v25   ;;  %v2413_v52 = vpop.permute.xlu2 %186 }
  0x9d   :  { %391 = vperm.xlu0 %1976, %v2337_v30   ;;  %v2416_v53 = vpop.permute.xlu1 %136  ;;  %v2418_v54 = vpop.permute.xlu0 %131 }
  0xa4   :  { %395 = vperm.xlu1 %1977, %v2332_v29   ;;  %399 = vperm.xlu2 %1975, %v2327_v28   ;;  %v2427_v56 = vpop.permute.xlu2 %201  ;;  %v253_v29 = vadd.f32 %v2441_v61, %v218_v60  ;;  %v255_v60 = vadd.f32 %v2441_v61, %v220_v41  ;;  %v258_v41 = vadd.f32 %v2441_v61, %v223_v35 }
  0xa5   :  { %403 = vperm.xlu0 %1976, %v2350_v32   ;;  %v2430_v57 = vpop.permute.xlu1 %151  ;;  %v2432_v58 = vpop.permute.xlu0 %146  ;;  %v2453_v32 = vperm.slane %v2423_v55, 1 }
  0xac   :  { %407 = vperm.xlu1 %1977, %v2345_v31   ;;  %1978 = vset.pattern.permute.xlu2 %v3557_v62 }
  0xad   :  { %1980 = vset.pattern.permute.xlu0 %v3561_v0  ;;  %v2447_v33 = vpop.permute.xlu1 %166  ;;  %476 = vperm.xlu2 %1978, %v2175_v3   ;;  %v2450_v39 = vpop.permute.xlu0 %161 }
  0xae   :  { %733 = vperm.xlu0 %1980, %v2260_v17   ;;  %v284_v31 = vpop.permute.xlu2 %283 }
  0xaf   :  { %v411_v24 = vmul.f32 %v2453_v32, %v284_v31 }
  0xb1   :  { %v2457_v62 = vadd.f32 %v411_v24, %v250_v63 }
  0xb4   :  { %1979 = vset.pattern.permute.xlu1 %v3590_v19 }
  0xb5   :  { %484 = vperm.xlu1 %1979, %v2170_v2   ;;  %v2462_v0 = vpop.permute.xlu1 %181  ;;  %488 = vperm.xlu2 %1978, %v2188_v5   ;;  %v2465_v22 = vpop.permute.xlu0 %176 }
  0xb6   :  { %673 = vperm.xlu0 %1980, %v2193_v6   ;;  %v296_v23 = vpop.permute.xlu2 %295 }
  0xb7   :  { %v414_v24 = vmul.f32 %v2453_v32, %v296_v23 }
  0xb9   :  { %v2470_v31 = vadd.f32 %v414_v24, %v253_v29 }
  0xbd   :  { %492 = vperm.xlu1 %1979, %v2165_v1   ;;  %v2475_v63 = vpop.permute.xlu1 %196  ;;  %496 = vperm.xlu2 %1978, %v2183_v4   ;;  %v2478_v5 = vpop.permute.xlu0 %191 }
  0xbe   :  { %773 = vperm.xlu0 %1980, %v2309_v25   ;;  %v304_v2 = vpop.permute.xlu2 %303 }
  0xbf   :  { %v416_v23 = vmul.f32 %v2453_v32, %v304_v2 }
  0xc1   :  { %v2483_v29 = vadd.f32 %v416_v23, %v255_v60  ;;  %v217_v23 = vmul.f32 %v2435_v59, %v2375_v38 }
  0xc5   :  { %504 = vperm.xlu1 %1979, %v2206_v8   ;;  %v2488_v24 = vpop.permute.xlu1 %211  ;;  %508 = vperm.xlu2 %1978, %v2201_v7   ;;  %v2491_v4 = vpop.permute.xlu0 %206  ;;  %v216_v8 = vmul.f32 %v2435_v59, %v2382_v42 }
  0xc6   :  { %3591 = vst [vmem:[#allocation16_spill] sm:$0xff] %v2488_v24  ;;  %713 = vperm.xlu0 %1980, %v2219_v10   ;;  %v316_v1 = vpop.permute.xlu2 %315 }
  0xc7   :  { %v419_v2 = vmul.f32 %v2453_v32, %v316_v1  ;;  %v261_v1 = vadd.f32 %v2441_v61, %v226_v36  ;;  %v219_v36 = vmul.f32 %v2435_v59, %v2357_v34 }
  0xc9   :  { %v2496_v60 = vadd.f32 %v419_v2, %v258_v41  ;;  %v252_v41 = vadd.f32 %v2441_v61, %v217_v23  ;;  %v229_v23 = vmul.f32 %v2435_v59, %v2379_v40 }
  0xcb   :  { %3592 = vst [vmem:[#allocation17_spill] sm:$0xff] %v2496_v60  ;;  %v251_v60 = vadd.f32 %v2441_v61, %v216_v8 }
  0xcd   :  { %516 = vperm.xlu1 %1979, %v2224_v11   ;;  %520 = vperm.xlu2 %1978, %v2219_v10  }
  0xce   :  { %785 = vperm.xlu0 %1980, %v2327_v28   ;;  %v292_v35 = vpop.permute.xlu1 %291  ;;  %v328_v24 = vpop.permute.xlu2 %327 }
  0xcf   :  { %v413_v37 = vmul.f32 %v2453_v32, %v292_v35  ;;  %v422_v2 = vmul.f32 %v2453_v32, %v328_v24  ;;  %v288_v38 = vpop.permute.xlu0 %287  ;;  %v221_v24 = vmul.f32 %v2435_v59, %v2391_v45 }
  0xd0   :  { %v412_v42 = vmul.f32 %v2453_v32, %v288_v38 }
  0xd1   :  { %v2513_v11 = vadd.f32 %v413_v37, %v252_v41  ;;  %v2515_v10 = vadd.f32 %v422_v2, %v261_v1  ;;  %v264_v1 = vadd.f32 %v2441_v61, %v229_v23  ;;  %v256_v45 = vadd.f32 %v2441_v61, %v221_v24 }
  0xd2   :  { %v2517_v28 = vadd.f32 %v412_v42, %v251_v60  ;;  %v254_v60 = vadd.f32 %v2441_v61, %v219_v36  ;;  %v232_v36 = vmul.f32 %v2435_v59, %v2386_v43  ;;  %v222_v23 = vmul.f32 %v2435_v59, %v2389_v44 }
  0xd5   :  { %528 = vperm.xlu1 %1979, %v2242_v14   ;;  %532 = vperm.xlu2 %1978, %v2237_v13  }
  0xd6   :  { %1991 = vset.pattern.permute.xlu0 %v3590_v19  ;;  %v300_v8 = vpop.permute.xlu1 %299  ;;  %v340_v35 = vpop.permute.xlu2 %339 }
  0xd7   :  { %v415_v34 = vmul.f32 %v2453_v32, %v300_v8  ;;  %v425_v41 = vmul.f32 %v2453_v32, %v340_v35  ;;  %480 = vperm.xlu0 %1991, %v2193_v6   ;;  %v308_v40 = vpop.permute.xlu0 %307  ;;  %v224_v6 = vmul.f32 %v2435_v59, %v2400_v48  ;;  %v267_v35 = vadd.f32 %v2441_v61, %v232_v36 }
  0xd8   :  { %v417_v37 = vmul.f32 %v2453_v32, %v308_v40  ;;  %v227_v36 = vmul.f32 %v2435_v59, %v2409_v51 }
  0xd9   :  { %v2535_v2 = vadd.f32 %v415_v34, %v254_v60  ;;  %v2537_v38 = vadd.f32 %v425_v41, %v264_v1  ;;  %v257_v60 = vadd.f32 %v2441_v61, %v222_v23  ;;  %v259_v34 = vadd.f32 %v2441_v61, %v224_v6 }
  0xda   :  { %v2539_v42 = vadd.f32 %v417_v37, %v256_v45  ;;  %v235_v45 = vmul.f32 %v2435_v59, %v2395_v46  ;;  %v225_v37 = vmul.f32 %v2435_v59, %v2398_v47 }
  0xdd   :  { %540 = vperm.xlu1 %1979, %v2260_v17   ;;  %544 = vperm.xlu2 %1978, %v2255_v16  }
  0xde   :  { %v312_v24 = vpop.permute.xlu1 %311  ;;  %v352_v8 = vpop.permute.xlu2 %351 }
  0xdf   :  { %v418_v1 = vmul.f32 %v2453_v32, %v312_v24  ;;  %v428_v43 = vmul.f32 %v2453_v32, %v352_v8  ;;  %500 = vperm.xlu0 %1991, %v2211_v9   ;;  %v320_v44 = vpop.permute.xlu0 %319  ;;  %v270_v24 = vadd.f32 %v2441_v61, %v235_v45  ;;  %v260_v8 = vadd.f32 %v2441_v61, %v225_v37 }
  0xe0   :  { %v420_v48 = vmul.f32 %v2453_v32, %v320_v44  ;;  %v230_v45 = vmul.f32 %v2435_v59, %v2418_v54  ;;  %v3593_v37 = vmov 3  }
  0xe1   :  { %v2556_v17 = vadd.f32 %v418_v1, %v257_v60  ;;  %v2558_v41 = vadd.f32 %v428_v43, %v267_v35  ;;  %v262_v60 = vadd.f32 %v2441_v61, %v227_v36 }
  0xe2   :  { %v2560_v40 = vadd.f32 %v420_v48, %v259_v34  ;;  %v238_v34 = vmul.f32 %v2435_v59, %v2404_v49  ;;  %v228_v48 = vmul.f32 %v2435_v59, %v2407_v50 }
  0xe4   :  { %v263_v49 = vadd.f32 %v2441_v61, %v228_v48 }
  0xe5   :  { %572 = vperm.xlu1 %1979, %v2319_v27   ;;  %576 = vperm.xlu2 %1978, %v2314_v26  }
  0xe6   :  { %v324_v23 = vpop.permute.xlu1 %323  ;;  %v364_v6 = vpop.permute.xlu2 %363 }
  0xe7   :  { %v421_v35 = vmul.f32 %v2453_v32, %v324_v23  ;;  %v431_v46 = vmul.f32 %v2453_v32, %v364_v6  ;;  %512 = vperm.xlu0 %1991, %v2229_v12   ;;  %v332_v47 = vpop.permute.xlu0 %331  ;;  %v273_v6 = vadd.f32 %v2441_v61, %v238_v34 }
  0xe8   :  { %v423_v51 = vmul.f32 %v2453_v32, %v332_v47  ;;  %v241_v47 = vmul.f32 %v2435_v59, %v2413_v52 }
  0xe9   :  { %v2577_v1 = vadd.f32 %v421_v35, %v260_v8  ;;  %v2579_v43 = vadd.f32 %v431_v46, %v270_v24  ;;  %v265_v8 = vadd.f32 %v2441_v61, %v230_v45 }
  0xea   :  { %v2581_v44 = vadd.f32 %v423_v51, %v262_v60  ;;  %v231_v60 = vmul.f32 %v2435_v59, %v2416_v53  ;;  %v233_v51 = vmul.f32 %v2435_v59, %v2432_v58  ;;  %v276_v45 = vadd.f32 %v2441_v61, %v241_v47 }
  0xed   :  { %1981 = vset.pattern.permute.xlu1 %v3593_v37  ;;  %1982 = vset.pattern.permute.xlu2 %v3593_v37 }
  0xee   :  { %737 = vperm.xlu1 %1981, %v2255_v16   ;;  %v336_v36 = vpop.permute.xlu1 %335  ;;  %765 = vperm.xlu2 %1982, %v2319_v27   ;;  %v376_v23 = vpop.permute.xlu2 %375 }
  0xef   :  { %v424_v24 = vmul.f32 %v2453_v32, %v336_v36  ;;  %v434_v50 = vmul.f32 %v2453_v32, %v376_v23  ;;  %524 = vperm.xlu0 %1991, %v2247_v15   ;;  %v344_v54 = vpop.permute.xlu0 %343  ;;  %v266_v36 = vadd.f32 %v2441_v61, %v231_v60 }
  0xf0   :  { %v426_v35 = vmul.f32 %v2453_v32, %v344_v54  ;;  %v236_v54 = vmul.f32 %v2435_v59, %v2450_v39 }
  0xf1   :  { %v2600_v16 = vadd.f32 %v424_v24, %v263_v49  ;;  %v2602_v46 = vadd.f32 %v434_v50, %v273_v6  ;;  %v268_v6 = vadd.f32 %v2441_v61, %v233_v51  ;;  %v244_v24 = vmul.f32 %v2435_v59, %v2427_v56 }
  0xf2   :  { %v2604_v27 = vadd.f32 %v426_v35, %v265_v8  ;;  %v234_v50 = vmul.f32 %v2435_v59, %v2430_v57 }
  0xf3   :  { %v279_v47 = vadd.f32 %v2441_v61, %v244_v24 }
  0xf4   :  { %v269_v60 = vadd.f32 %v2441_v61, %v234_v50 }
  0xf6   :  { %769 = vperm.xlu1 %1981, %v2314_v26   ;;  %v348_v34 = vpop.permute.xlu1 %347  ;;  %669 = vperm.xlu2 %1982, %v2175_v3   ;;  %v388_v48 = vpop.permute.xlu2 %387 }
  0xf7   :  { %v427_v23 = vmul.f32 %v2453_v32, %v348_v34  ;;  %v437_v52 = vmul.f32 %v2453_v32, %v388_v48  ;;  %536 = vperm.xlu0 %1991, %v2265_v18   ;;  %v356_v53 = vpop.permute.xlu0 %355  ;;  %v271_v34 = vadd.f32 %v2441_v61, %v236_v54 }
  0xf8   :  { %v429_v58 = vmul.f32 %v2453_v32, %v356_v53 }
  0xf9   :  { %v2621_v26 = vadd.f32 %v427_v23, %v266_v36  ;;  %v2623_v49 = vadd.f32 %v437_v52, %v276_v45  ;;  %v237_v45 = vmul.f32 %v2435_v59, %v2447_v33  ;;  %v239_v36 = vmul.f32 %v2435_v59, %v2465_v22 }
  0xfa   :  { %v2625_v3 = vadd.f32 %v429_v58, %v268_v6  ;;  %v2653_v23 = vperm.slane %v2423_v55, 2 }
  0xfb   :  { %v272_v53 = vadd.f32 %v2441_v61, %v237_v45  ;;  %v274_v22 = vadd.f32 %v2441_v61, %v239_v36 }
  0xfe   :  { %701 = vperm.xlu1 %1981, %v2201_v7   ;;  %v360_v8 = vpop.permute.xlu1 %359  ;;  %705 = vperm.xlu2 %1982, %v2229_v12   ;;  %v400_v35 = vpop.permute.xlu2 %399 }
  0xff   :  { %v430_v51 = vmul.f32 %v2453_v32, %v360_v8  ;;  %v440_v56 = vmul.f32 %v2453_v32, %v400_v35  ;;  %548 = vperm.xlu0 %1991, %v2283_v21   ;;  %v368_v57 = vpop.permute.xlu0 %367 }
 0x100   :  { %v432_v39 = vmul.f32 %v2453_v32, %v368_v57  ;;  %v3594_v57 = vld [vmem:[#allocation13_spill] sm:$0xff] }
 0x101   :  { %v2642_v7 = vadd.f32 %v430_v51, %v269_v60  ;;  %v2644_v48 = vadd.f32 %v440_v56, %v279_v47  ;;  %v240_v47 = vmul.f32 %v2435_v59, %v2462_v0 }
 0x102   :  { %v2646_v12 = vadd.f32 %v432_v39, %v271_v34 }
 0x103   :  { %v275_v51 = vadd.f32 %v2441_v61, %v240_v47 }
 0x106   :  { %1983 = vset.pattern.permute.xlu1 %v3590_v19  ;;  %v372_v52 = vpop.permute.xlu1 %371  ;;  %1984 = vset.pattern.permute.xlu2 %v3590_v19 }
 0x107   :  { %v433_v6 = vmul.f32 %v2453_v32, %v372_v52  ;;  %552 = vperm.xlu0 %1991, %v2278_v20   ;;  %v380_v58 = vpop.permute.xlu0 %379  ;;  %580 = vperm.xlu1 %1983, %v2309_v25   ;;  %v477_v33 = vpop.permute.xlu2 %476  ;;  %v242_v25 = vmul.f32 %v2435_v59, %v2478_v5 }
 0x108   :  { %v435_v24 = vmul.f32 %v2453_v32, %v380_v58  ;;  %584 = vperm.xlu2 %1984, %v2337_v30   ;;  %v604_v50 = vmul.f32 %v2653_v23, %v477_v33 }
 0x109   :  { %v2665_v54 = vadd.f32 %v433_v6, %v272_v53  ;;  %v243_v53 = vmul.f32 %v2435_v59, %v2475_v63  ;;  %v245_v6 = vmul.f32 %v2435_v59, %v2491_v4  ;;  %v3596_v4 = vld [vmem:[#allocation3_spill] sm:$0xff] }
 0x10a   :  { %v2667_v8 = vadd.f32 %v435_v24, %v274_v22  ;;  %v2670_v35 = vadd.f32 %v604_v50, %v2457_v62  ;;  %v277_v62 = vadd.f32 %v2441_v61, %v242_v25  ;;  %v3595_v22 = vld [vmem:[#allocation10_spill] sm:$0xff]  ;;  %v1848_v25 = vld [vmem:[%s3548_s3 + $0x38] sm:$0xff] }
 0x10b   :  { %v278_v33 = vadd.f32 %v2441_v61, %v243_v53  ;;  %v280_v50 = vadd.f32 %v2441_v61, %v245_v6  ;;  %977 = vmatpush.bf16.msra.mxu0 %v1848_v25  ;;  %1945 = vmatpush.bf16.msra.mxu2 %v1848_v25  ;;  %v3599_v6 = vld [vmem:[#allocation5_spill] sm:$0xff] }
 0x10c   :  { %1946 = vmatpush.bf16.msra.mxu3 %v1848_v25  ;;  %1944 = vmatpush.bf16.msra.mxu1 %v1848_v25  ;;  %v3602_v25 = vld [vmem:[#allocation8_spill] sm:$0xff] }
 0x10e   :  { %v384_v60 = vpop.permute.xlu1 %383 }
 0x10f   :  { %v436_v56 = vmul.f32 %v2453_v32, %v384_v60  ;;  %588 = vperm.xlu0 %1991, %v3594_v57   ;;  %v392_v34 = vpop.permute.xlu0 %391  ;;  %1985 = vset.pattern.permute.xlu1 %v3593_v37  ;;  %v489_v39 = vpop.permute.xlu2 %488 }
 0x110   :  { %v438_v45 = vmul.f32 %v2453_v32, %v392_v34  ;;  %1986 = vset.pattern.permute.xlu2 %v3593_v37  ;;  %v607_v0 = vmul.f32 %v2653_v23, %v489_v39  ;;  %741 = vperm.xlu1 %1985, %v2283_v21  }
 0x111   :  { %v2685_v5 = vadd.f32 %v436_v56, %v275_v51  ;;  %745 = vperm.xlu2 %1986, %v2278_v20   ;;  %v3597_v56 = vld [vmem:[#allocation16_spill] sm:$0xff] }
 0x112   :  { %v2688_v36 = vadd.f32 %v438_v45, %v277_v62  ;;  %v2691_v52 = vadd.f32 %v607_v0, %v2470_v31  ;;  %v246_v34 = vmul.f32 %v2435_v59, %v3597_v56  ;;  %v3598_v59 = vld [vmem:[#allocation9_spill] sm:$0xff] }
 0x113   :  { %v1844_v56 = vld [vmem:[%s3548_s3 + $0x18] sm:$0xff] }
 0x114   :  { %v281_v62 = vadd.f32 %v2441_v61, %v246_v34  ;;  %v3601_v61 = vld [vmem:[#allocation17_spill] sm:$0xff] }
 0x116   :  { %v396_v58 = vpop.permute.xlu1 %395 }
 0x117   :  { %v439_v21 = vmul.f32 %v2453_v32, %v396_v58  ;;  %564 = vperm.xlu0 %1991, %v3595_v22   ;;  %v404_v24 = vpop.permute.xlu0 %403  ;;  %v497_v20 = vpop.permute.xlu2 %496 }
 0x118   :  { %v441_v31 = vmul.f32 %v2453_v32, %v404_v24  ;;  %v609_v47 = vmul.f32 %v2653_v23, %v497_v20  ;;  %777 = vperm.xlu1 %1985, %v2337_v30   ;;  %v1847_v30 = vld [vmem:[%s3548_s3 + $0x30] sm:$0xff]  ;;  %v1845_v24 = vld [vmem:[%s3548_s3 + $0x20] sm:$0xff] }
 0x119   :  { %v2704_v63 = vadd.f32 %v439_v21, %v278_v33  ;;  %677 = vperm.xlu2 %1986, %v3596_v4   ;;  %978 = vmatpush.bf16.msra.mxu0 %v1847_v30  ;;  %v3600_v33 = vld [vmem:[#allocation7_spill] sm:$0xff] }
 0x11a   :  { %v2710_v60 = vadd.f32 %v441_v31, %v280_v50  ;;  %v2713_v51 = vadd.f32 %v609_v47, %v2483_v29  ;;  %1948 = vmatpush.bf16.msra.mxu2 %v1847_v30  ;;  %1949 = vmatpush.bf16.msra.mxu3 %v1847_v30 }
 0x11b   :  { %1947 = vmatpush.bf16.msra.mxu1 %v1847_v30 }
 0x11e   :  { %v408_v39 = vpop.permute.xlu1 %407 }
 0x11f   :  { %v442_v45 = vmul.f32 %v2453_v32, %v408_v39  ;;  %1995 = vset.pattern.permute.xlu0 %v3593_v37  ;;  %v509_v29 = vpop.permute.xlu2 %508  ;;  %v1846_v32 = vld [vmem:[%s3548_s3 + $0x28] sm:$0xff] }
 0x120   :  { %v612_v0 = vmul.f32 %v2653_v23, %v509_v29  ;;  %761 = vperm.xlu0 %1995, %v3598_v59   ;;  %v2725_v53 = vpop.permute.xlu0 %733  ;;  %681 = vperm.xlu1 %1985, %v3599_v6   ;;  %v3603_v39 = vld [vmem:[#allocation11_spill] sm:$0xff] }
 0x121   :  { %v2728_v58 = vadd.f32 %v442_v45, %v281_v62  ;;  %709 = vperm.xlu2 %1986, %v3600_v33   ;;  %979 = vmatpush.bf16.msra.mxu0 %v1846_v32  ;;  %v1842_v6 = vld [vmem:[%s3548_s3 + $0x8] sm:$0xff] }
 0x122   :  { %v2735_v21 = vadd.f32 %v612_v0, %v3601_v61  ;;  %1951 = vmatpush.bf16.msra.mxu2 %v1846_v32  ;;  %1952 = vmatpush.bf16.msra.mxu3 %v1846_v32  ;;  %v3604_v0 = vld [vmem:[#allocation12_spill] sm:$0xff]  ;;  %v2776_v61 = vperm.slane %v2423_v55, 3 }
 0x123   :  { %1950 = vmatpush.bf16.msra.mxu1 %v1846_v32 }
 0x125   :  { %980 = vmatpush.bf16.msra.mxu0 %v1845_v24 }
 0x126   :  { %1954 = vmatpush.bf16.msra.mxu2 %v1845_v24  ;;  %1955 = vmatpush.bf16.msra.mxu3 %v1845_v24 }
 0x127   :  { %v485_v20 = vpop.permute.xlu1 %484  ;;  %v521_v50 = vpop.permute.xlu2 %520  ;;  %1953 = vmatpush.bf16.msra.mxu1 %v1845_v24  ;;  %v1841_v24 = vld [vmem:[%s3548_s3] sm:$0xff] }
 0x128   :  { %v606_v31 = vmul.f32 %v2653_v23, %v485_v20  ;;  %v615_v47 = vmul.f32 %v2653_v23, %v521_v50  ;;  %725 = vperm.xlu0 %1995, %v2237_v13   ;;  %v2743_v4 = vpop.permute.xlu0 %673  ;;  %1987 = vset.pattern.permute.xlu1 %v3590_v19  ;;  %v1843_v13 = vld [vmem:[%s3548_s3 + $0x10] sm:$0xff] }
 0x129   :  { %1988 = vset.pattern.permute.xlu2 %v3590_v19  ;;  %556 = vperm.xlu1 %1987, %v3602_v25  }
 0x12a   :  { %v2752_v34 = vadd.f32 %v606_v31, %v2513_v11  ;;  %v647_v30 = vadd.f32 %v615_v47, %v2515_v10  ;;  %560 = vperm.xlu2 %1988, %v3603_v39   ;;  %981 = vmatpush.bf16.msra.mxu0 %v1844_v56 }
 0x12b   :  { %1957 = vmatpush.bf16.msra.mxu2 %v1844_v56  ;;  %1958 = vmatpush.bf16.msra.mxu3 %v1844_v56 }
 0x12c   :  { %1956 = vmatpush.bf16.msra.mxu1 %v1844_v56 }
 0x12e   :  { %982 = vmatpush.bf16.msra.mxu0 %v1843_v13 }
 0x12f   :  { %v493_v62 = vpop.permute.xlu1 %492  ;;  %v533_v45 = vpop.permute.xlu2 %532  ;;  %1960 = vmatpush.bf16.msra.mxu2 %v1843_v13  ;;  %1961 = vmatpush.bf16.msra.mxu3 %v1843_v13 }
 0x130   :  { %v608_v11 = vmul.f32 %v2653_v23, %v493_v62  ;;  %v618_v29 = vmul.f32 %v2653_v23, %v533_v45  ;;  %v2761_v10 = vpop.permute.xlu0 %773  ;;  %1959 = vmatpush.bf16.msra.mxu1 %v1843_v13  ;;  %v3605_v62 = vld [vmem:[#allocation2_spill] sm:$0xff]  ;;  %v3606_v45 = vld [vmem:[#allocation4_spill] sm:$0xff] }
 0x131   :  { %592 = vperm.xlu1 %1987, %v3604_v0   ;;  %v798_v0 = vmul.f32 %v2776_v61, %v2743_v4 }
 0x132   :  { %v2768_v33 = vadd.f32 %v608_v11, %v2535_v2  ;;  %v2771_v32 = vadd.f32 %v618_v29, %v2537_v38  ;;  %1989 = vset.pattern.permute.xlu2 %v3593_v37  ;;  %983 = vmatpush.bf16.msra.mxu0 %v1842_v6 }
 0x133   :  { %749 = vperm.xlu2 %1989, %v3602_v25   ;;  %1963 = vmatpush.bf16.msra.mxu2 %v1842_v6 }
 0x134   :  { %1964 = vmatpush.bf16.msra.mxu3 %v1842_v6  ;;  %1962 = vmatpush.bf16.msra.mxu1 %v1842_v6 }
 0x136   :  { %984 = vmatpush.bf16.msra.mxu0 %v1841_v24 }
 0x137   :  { %v505_v2 = vpop.permute.xlu1 %504  ;;  %v545_v20 = vpop.permute.xlu2 %544  ;;  %1966 = vmatpush.bf16.msra.mxu2 %v1841_v24 }
 0x138   :  { %v611_v38 = vmul.f32 %v2653_v23, %v505_v2  ;;  %v714_v50 = vpop.permute.xlu0 %713  ;;  %1967 = vmatpush.bf16.msra.mxu3 %v1841_v24  ;;  %1965 = vmatpush.bf16.msra.mxu1 %v1841_v24 }
 0x139   :  { %v808_v31 = vmul.f32 %v2776_v61, %v714_v50  ;;  %1990 = vset.pattern.permute.xlu1 %v3593_v37 }
 0x13a   :  { %v2785_v55 = vadd.f32 %v611_v38, %v2556_v17  ;;  %753 = vperm.xlu1 %1990, %v3603_v39  }
 0x13b   :  { %v2788_v47 = vadd.f32 %v808_v31, %v647_v30  ;;  %781 = vperm.xlu2 %1989, %v3594_v57  }
 0x13f   :  { %v2791_v25 = vpop.permute.xlu1 %516  ;;  %v577_v56 = vpop.permute.xlu2 %576 }
 0x140   :  { %v2793_v13 = vpop.permute.xlu0 %785 }
 0x142   :  { %685 = vperm.xlu1 %1990, %v3605_v62  }
 0x143   :  { %689 = vperm.xlu2 %1989, %v3606_v45  }
 0x147   :  { %v529_v17 = vpop.permute.xlu1 %528 }
 0x148   :  { %v617_v11 = vmul.f32 %v2653_v23, %v529_v17  ;;  %v766_v39 = vpop.permute.xlu2 %765 }
 0x149   :  { %v481_v29 = vpop.permute.xlu0 %480 }
 0x14a   :  { %v2799_v30 = vadd.f32 %v617_v11, %v2600_v16  ;;  %v605_v57 = vmul.f32 %v2653_v23, %v481_v29  ;;  %717 = vperm.xlu1 %1990, %v2247_v15   ;;  %v3607_v15 = vld [vmem:[#allocation15_spill] sm:$0xff] }
 0x14b   :  { %721 = vperm.xlu2 %1989, %v2242_v14  }
 0x14c   :  { %v637_v6 = vadd.f32 %v605_v57, %v2517_v28 }
 0x14e   :  { %v830_v31 = vadd.f32 %v798_v0, %v637_v6  ;;  %v3608_v0 = vld [vmem:[#allocation14_spill] sm:$0xff] }
 0x14f   :  { %v541_v24 = vpop.permute.xlu1 %540 }
 0x150   :  { %v670_v2 = vpop.permute.xlu2 %669  ;;  %v862_v4 = vmax.f32 %v830_v31, 0.0  ;;  %v620_v29 = vmul.f32 %v2653_v23, %v541_v24 }
 0x151   :  { %v797_v38 = vmul.f32 %v2776_v61, %v670_v2  ;;  %v501_v50 = vpop.permute.xlu0 %500 }
 0x152   :  { %v610_v16 = vmul.f32 %v2653_v23, %v501_v50  ;;  %1992 = vset.pattern.permute.xlu1 %v3590_v19 }
 0x153   :  { %v829_v62 = vadd.f32 %v797_v38, %v2670_v35  ;;  %1993 = vset.pattern.permute.xlu2 %v3590_v19  ;;  %568 = vperm.xlu1 %1992, %v3598_v59   ;;  %v813_v19 = vmul.f32 %v2776_v61, %v2725_v53  ;;  %v652_v35 = vadd.f32 %v620_v29, %v2621_v26 }
 0x154   :  { %v2814_v14 = vadd.f32 %v610_v16, %v2539_v42  ;;  %596 = vperm.xlu2 %1993, %v3607_v15   ;;  %v621_v42 = vmul.f32 %v2653_v23, %v545_v20  ;;  %v629_v26 = vmul.f32 %v2653_v23, %v577_v56 }
 0x155   :  { %v861_v28 = vmax.f32 %v829_v62, 0.0  ;;  %v845_v50 = vadd.f32 %v813_v19, %v652_v35 }
 0x156   :  { %v653_v6 = vadd.f32 %v621_v42, %v2558_v41  ;;  %v821_v41 = vmul.f32 %v2776_v61, %v766_v39 }
 0x157   :  { %v573_v45 = vpop.permute.xlu1 %572  ;;  %v893_v17 = vpack.c.bf16 %v862_v4, %v861_v28  ;;  %v877_v28 = vmax.f32 %v845_v50, 0.0 }
 0x158   :  { %v706_v11 = vpop.permute.xlu2 %705  ;;  %v628_v24 = vmul.f32 %v2653_v23, %v573_v45 }
 0x159   :  { %v513_v57 = vpop.permute.xlu0 %512  ;;  %985 = vmatmul.bf16.vlgmr.msra.gmra.mxu0 %v893_v17  ;;  %v661_v17 = vadd.f32 %v629_v26, %v2685_v5  ;;  %v806_v5 = vmul.f32 %v2776_v61, %v706_v11  ;;  %v614_v11 = vmul.f32 %v2653_v23, %v2791_v25 }
 0x15a   :  { %v660_v20 = vadd.f32 %v628_v24, %v2667_v8 }
 0x15b   :  { %600 = vperm.xlu1 %1992, %v3608_v0  }
 0x15c   :  { %1994 = vset.pattern.permute.xlu2 %v3593_v37  ;;  %v853_v29 = vadd.f32 %v821_v41, %v660_v20 }
 0x15d   :  { %757 = vperm.xlu2 %1994, %v3595_v22  }
 0x15e   :  { %v885_v35 = vmax.f32 %v853_v29, 0.0 }
 0x160   :  { %v738_v59 = vpop.permute.xlu1 %737 }
 0x161   :  { %v814_v2 = vmul.f32 %v2776_v61, %v738_v59  ;;  %v525_v38 = vpop.permute.xlu0 %524 }
 0x162   :  { %v616_v31 = vmul.f32 %v2653_v23, %v525_v38  ;;  %v2829_v16 = vpop.permute.xlu2 %584 }
 0x163   :  { %v846_v53 = vadd.f32 %v814_v2, %v653_v6  ;;  %1996 = vset.pattern.permute.xlu1 %v3593_v37  ;;  %v613_v37 = vmul.f32 %v2653_v23, %v513_v57  ;;  %v3609_v57 = vld [vmem:[#allocation6_spill] sm:$0xff] }
 0x164   :  { %v2834_v22 = vadd.f32 %v616_v31, %v2581_v44  ;;  %789 = vperm.xlu1 %1996, %v3607_v15  }
 0x165   :  { %v878_v62 = vmax.f32 %v846_v53, 0.0  ;;  %793 = vperm.xlu2 %1994, %v3608_v0   ;;  %v645_v0 = vadd.f32 %v613_v37, %v2560_v40 }
 0x167   :  { %v901_v4 = vpack.c.bf16 %v878_v62, %v877_v28  ;;  %v838_v24 = vadd.f32 %v806_v5, %v645_v0  ;;  %v646_v28 = vadd.f32 %v614_v11, %v2577_v1 }
 0x168   :  { %v770_v45 = vpop.permute.xlu1 %769 }
 0x169   :  { %v822_v56 = vmul.f32 %v2776_v61, %v770_v45  ;;  %v537_v44 = vpop.permute.xlu0 %536  ;;  %1025 = vmatmul.bf16.vlgmr.msra.gmra.mxu2 %v901_v4 }
 0x16a   :  { %v619_v15 = vmul.f32 %v2653_v23, %v537_v44  ;;  %v872_v44 = vmax.f32 %v2788_v47, 0.0 }
 0x16b   :  { %v854_v39 = vadd.f32 %v822_v56, %v661_v17  ;;  %v746_v19 = vpop.permute.xlu2 %745 }
 0x16c   :  { %v2845_v8 = vadd.f32 %v619_v15, %v2604_v27  ;;  %693 = vperm.xlu1 %1996, %v2211_v9   ;;  %v870_v9 = vmax.f32 %v838_v24, 0.0  ;;  %v816_v25 = vmul.f32 %v2776_v61, %v746_v19 }
 0x16d   :  { %v886_v42 = vmax.f32 %v854_v39, 0.0  ;;  %697 = vperm.xlu2 %1994, %v3609_v57  }
 0x16f   :  { %v905_v59 = vpack.c.bf16 %v886_v42, %v885_v35  ;;  %v631_v42 = vmul.f32 %v2653_v23, %v2829_v16 }
 0x170   :  { %v702_v6 = vpop.permute.xlu1 %701 }
 0x171   :  { %v805_v2 = vmul.f32 %v2776_v61, %v702_v6  ;;  %v549_v38 = vpop.permute.xlu0 %548  ;;  %1045 = vmatmul.bf16.vlgmr.msra.gmra.mxu3 %v905_v59  ;;  %v663_v47 = vadd.f32 %v631_v42, %v2688_v36 }
 0x172   :  { %v622_v37 = vmul.f32 %v2653_v23, %v549_v38 }
 0x173   :  { %v837_v27 = vadd.f32 %v805_v2, %v2735_v21  ;;  %v678_v50 = vpop.permute.xlu2 %677  ;;  %v823_v21 = vmul.f32 %v2776_v61, %v2761_v10 }
 0x174   :  { %729 = vperm.xlu1 %1996, %v2265_v18   ;;  %v654_v10 = vadd.f32 %v622_v37, %v2625_v3  ;;  %v799_v3 = vmul.f32 %v2776_v61, %v678_v50 }
 0x175   :  { %v869_v40 = vmax.f32 %v837_v27, 0.0 }
 0x176   :  { %v831_v16 = vadd.f32 %v799_v3, %v2752_v34 }
 0x177   :  { %v897_v31 = vpack.c.bf16 %v870_v9, %v869_v40 }
 0x178   :  { %v863_v11 = vmax.f32 %v831_v16, 0.0 }
 0x179   :  { %v553_v53 = vpop.permute.xlu0 %552  ;;  %v581_v26 = vpop.permute.xlu1 %580  ;;  %1005 = vmatmul.bf16.vlgmr.msra.gmra.mxu1 %v897_v31 }
 0x17a   :  { %v630_v41 = vmul.f32 %v2653_v23, %v581_v26  ;;  %v623_v20 = vmul.f32 %v2653_v23, %v553_v53 }
 0x17b   :  { %v710_v62 = vpop.permute.xlu2 %709 }
 0x17c   :  { %v662_v18 = vadd.f32 %v630_v41, %v2623_v49  ;;  %v807_v4 = vmul.f32 %v2776_v61, %v710_v62  ;;  %v655_v56 = vadd.f32 %v623_v20, %v2642_v7 }
 0x17e   :  { %v839_v45 = vadd.f32 %v807_v4, %v646_v28  ;;  %v855_v17 = vadd.f32 %v823_v21, %v662_v18  ;;  %v848_v49 = vadd.f32 %v816_v25, %v655_v56 }
 0x180   :  { %v871_v29 = vmax.f32 %v839_v45, 0.0  ;;  %v880_v57 = vmax.f32 %v848_v49, 0.0  ;;  %v887_v38 = vmax.f32 %v855_v17, 0.0 }
 0x181   :  { %v589_v20 = vpop.permute.xlu0 %588 }
 0x182   :  { %v742_v15 = vpop.permute.xlu1 %741  ;;  %v898_v39 = vpack.c.bf16 %v872_v44, %v871_v29  ;;  %v632_v50 = vmul.f32 %v2653_v23, %v589_v20 }
 0x183   :  { %v815_v1 = vmul.f32 %v2776_v61, %v742_v15 }
 0x184   :  { %v561_v5 = vpop.permute.xlu2 %560  ;;  %v664_v34 = vadd.f32 %v632_v50, %v2704_v63 }
 0x185   :  { %v847_v0 = vadd.f32 %v815_v1, %v654_v10  ;;  %v625_v37 = vmul.f32 %v2653_v23, %v561_v5 }
 0x187   :  { %v879_v19 = vmax.f32 %v847_v0, 0.0  ;;  %v657_v10 = vadd.f32 %v625_v37, %v2646_v12 }
 0x189   :  { %1010 = vmatmul.bf16.gmra.mxu1 %v898_v39  ;;  %v902_v35 = vpack.c.bf16 %v880_v57, %v879_v19  ;;  %v565_v3 = vpop.permute.xlu0 %564 }
 0x18a   :  { %v778_v7 = vpop.permute.xlu1 %777 }
 0x18b   :  { %v824_v59 = vmul.f32 %v2776_v61, %v778_v7  ;;  %1030 = vmatmul.bf16.gmra.mxu2 %v902_v35 }
 0x18d   :  { %v856_v6 = vadd.f32 %v824_v59, %v663_v47  ;;  %v750_v2 = vpop.permute.xlu2 %749 }
 0x18e   :  { %v817_v56 = vmul.f32 %v2776_v61, %v750_v2 }
 0x18f   :  { %v888_v24 = vmax.f32 %v856_v6, 0.0 }
 0x191   :  { %v906_v27 = vpack.c.bf16 %v888_v24, %v887_v38 }
 0x192   :  { %v682_v9 = vpop.permute.xlu1 %681 }
 0x193   :  { %v800_v40 = vmul.f32 %v2776_v61, %v682_v9  ;;  %1050 = vmatmul.bf16.gmra.mxu3 %v906_v27 }
 0x195   :  { %v832_v31 = vadd.f32 %v800_v40, %v2691_v52  ;;  %v782_v53 = vpop.permute.xlu2 %781  ;;  %v826_v52 = vmul.f32 %v2776_v61, %v2793_v13 }
 0x196   :  { %v825_v62 = vmul.f32 %v2776_v61, %v782_v53 }
 0x197   :  { %v864_v36 = vmax.f32 %v832_v31, 0.0  ;;  %v626_v31 = vmul.f32 %v2653_v23, %v565_v3 }
 0x198   :  { %v857_v45 = vadd.f32 %v825_v62, %v664_v34 }
 0x199   :  { %v894_v26 = vpack.c.bf16 %v864_v36, %v863_v11  ;;  %v762_v36 = vpop.permute.xlu0 %761 }
 0x19a   :  { %v889_v29 = vmax.f32 %v857_v45, 0.0 }
 0x19b   :  { %v557_v41 = vpop.permute.xlu1 %556  ;;  %990 = vmatmul.bf16.gmra.mxu0 %v894_v26  ;;  %v658_v26 = vadd.f32 %v626_v31, %v2665_v54 }
 0x19c   :  { %v624_v4 = vmul.f32 %v2653_v23, %v557_v41 }
 0x19d   :  { %v690_v21 = vpop.permute.xlu2 %689 }
 0x19e   :  { %v656_v44 = vadd.f32 %v624_v4, %v2579_v43 }
 0x1a0   :  { %v849_v13 = vadd.f32 %v817_v56, %v656_v44 }
 0x1a2   :  { %v881_v5 = vmax.f32 %v849_v13, 0.0 }
 0x1a3   :  { %v593_v28 = vpop.permute.xlu1 %592 }
 0x1a4   :  { %v633_v18 = vmul.f32 %v2653_v23, %v593_v28 }
 0x1a5   :  { %v722_v1 = vpop.permute.xlu2 %721 }
 0x1a6   :  { %v665_v17 = vadd.f32 %v633_v18, %v2644_v48  ;;  %v802_v48 = vmul.f32 %v2776_v61, %v690_v21  ;;  %v810_v59 = vmul.f32 %v2776_v61, %v722_v1 }
 0x1a8   :  { %v858_v25 = vadd.f32 %v826_v52, %v665_v17  ;;  %v834_v43 = vadd.f32 %v802_v48, %v2713_v51  ;;  %v842_v38 = vadd.f32 %v810_v59, %v2799_v30  ;;  %v820_v30 = vmul.f32 %v2776_v61, %v762_v36  ;;  %v2911_v17 = vld [vmem:[%s3549_s4] ss:$0 sm:$0xff] }
 0x1aa   :  { %v890_v15 = vmax.f32 %v858_v25, 0.0  ;;  %v866_v47 = vmax.f32 %v834_v43, 0.0  ;;  %v874_v9 = vmax.f32 %v842_v38, 0.0 }
 0x1ac   :  { %v754_v63 = vpop.permute.xlu1 %753  ;;  %v907_v39 = vpack.c.bf16 %v890_v15, %v889_v29 }
 0x1ad   :  { %v818_v49 = vmul.f32 %v2776_v61, %v754_v63 }
 0x1ae   :  { %1055 = vmatmul.bf16.gmra.mxu3 %v907_v39  ;;  %v597_v7 = vpop.permute.xlu2 %596 }
 0x1af   :  { %v850_v0 = vadd.f32 %v818_v49, %v657_v10  ;;  %v634_v52 = vmul.f32 %v2653_v23, %v597_v7 }
 0x1b1   :  { %v882_v42 = vmax.f32 %v850_v0, 0.0  ;;  %v666_v37 = vadd.f32 %v634_v52, %v2710_v60 }
 0x1b3   :  { %v903_v19 = vpack.c.bf16 %v882_v42, %v881_v5  ;;  %v726_v5 = vpop.permute.xlu0 %725 }
 0x1b4   :  { %v686_v57 = vpop.permute.xlu1 %685 }
 0x1b5   :  { %v801_v35 = vmul.f32 %v2776_v61, %v686_v57  ;;  %1035 = vmatmul.bf16.gmra.mxu2 %v903_v19 }
 0x1b7   :  { %v833_v12 = vadd.f32 %v801_v35, %v2768_v33  ;;  %v758_v16 = vpop.permute.xlu2 %757  ;;  %v811_v35 = vmul.f32 %v2776_v61, %v726_v5 }
 0x1b8   :  { %v819_v11 = vmul.f32 %v2776_v61, %v758_v16 }
 0x1b9   :  { %v865_v6 = vmax.f32 %v833_v12, 0.0  ;;  %v843_v3 = vadd.f32 %v811_v35, %v2771_v32 }
 0x1ba   :  { %v851_v20 = vadd.f32 %v819_v11, %v658_v26 }
 0x1bb   :  { %v895_v24 = vpack.c.bf16 %v866_v47, %v865_v6  ;;  %v875_v38 = vmax.f32 %v843_v3, 0.0 }
 0x1bc   :  { %v718_v2 = vpop.permute.xlu1 %717  ;;  %v883_v62 = vmax.f32 %v851_v20, 0.0 }
 0x1bd   :  { %v809_v27 = vmul.f32 %v2776_v61, %v718_v2  ;;  %995 = vmatmul.bf16.gmra.mxu0 %v895_v24 }
 0x1bf   :  { %v841_v51 = vadd.f32 %v809_v27, %v2834_v22  ;;  %v794_v34 = vpop.permute.xlu2 %793 }
 0x1c0   :  { %v828_v54 = vmul.f32 %v2776_v61, %v794_v34 }
 0x1c1   :  { %v873_v40 = vmax.f32 %v841_v51, 0.0 }
 0x1c3   :  { %v899_v33 = vpack.c.bf16 %v874_v9, %v873_v40 }
 0x1c5   :  { %v569_v53 = vpop.permute.xlu1 %568  ;;  %1015 = vmatmul.bf16.gmra.mxu1 %v899_v33 }
 0x1c6   :  { %v627_v41 = vmul.f32 %v2653_v23, %v569_v53 }
 0x1c7   :  { %v698_v15 = vpop.permute.xlu2 %697 }
 0x1c8   :  { %v659_v22 = vadd.f32 %v627_v41, %v2602_v46  ;;  %v804_v39 = vmul.f32 %v2776_v61, %v698_v15 }
 0x1ca   :  { %v852_v50 = vadd.f32 %v820_v30, %v659_v22  ;;  %v836_v48 = vadd.f32 %v804_v39, %v2785_v55 }
 0x1cc   :  { %v884_v21 = vmax.f32 %v852_v50, 0.0  ;;  %v868_v7 = vmax.f32 %v836_v48, 0.0 }
 0x1cd   :  { %v601_v28 = vpop.permute.xlu1 %600 }
 0x1ce   :  { %v904_v18 = vpack.c.bf16 %v884_v21, %v883_v62  ;;  %v635_v4 = vmul.f32 %v2653_v23, %v601_v28  ;;  %v1674_v28 = vlaneseq }
 0x1d0   :  { %1040 = vmatmul.bf16.gmra.mxu2 %v904_v18  ;;  %v667_v45 = vadd.f32 %v635_v4, %v2728_v58  ;;  %v2941_v39 = vand.u32 127, %v1674_v28 }
 0x1d2   :  { %v860_v29 = vadd.f32 %v828_v54, %v667_v45  ;;  %vm1676_vm8 = vcmp.eq.s32.totalorder %v2941_v39, 0 }
 0x1d4   :  { %v892_v1 = vmax.f32 %v860_v29, 0.0 }
 0x1d6   :  { %v790_v46 = vpop.permute.xlu1 %789  ;;  %v986_v25 = vpop.f32.mrf.mxu0 }
 0x1d7   :  { %v827_v56 = vmul.f32 %v2776_v61, %v790_v46  ;;  %v987_v44 = vadd.f32 %v2911_v17, %v986_v25 }
 0x1d9   :  { %v859_v23 = vadd.f32 %v827_v56, %v666_v37  ;;  %v1066_v63 = vsub.f32 0.0, %v987_v44 }
 0x1db   :  { %v891_v58 = vmax.f32 %v859_v23, 0.0  ;;  %v1098_v10 = vmul.f32 1.442695, %v1066_v63 }
 0x1dd   :  { %1999 = vpow2.f32 %v1098_v10  ;;  %v908_v49 = vpack.c.bf16 %v892_v1, %v891_v58 }
 0x1de   :  { %v694_v13 = vpop.permute.xlu1 %693  ;;  %v988_v0 = vpop.f32.mrf.mxu0 }
 0x1df   :  { %v803_v60 = vmul.f32 %v2776_v61, %v694_v13  ;;  %v989_v42 = vadd.f32 %v2911_v17, %v988_v0  ;;  %1060 = vmatmul.bf16.gmra.mxu3 %v908_v49 }
 0x1e1   :  { %v835_v19 = vadd.f32 %v803_v60, %v2814_v14  ;;  %v1067_v57 = vsub.f32 0.0, %v989_v42 }
 0x1e3   :  { %v2000_v43 = vpop.eup %1999  ;;  %v867_v12 = vmax.f32 %v835_v19, 0.0  ;;  %v1100_v47 = vmul.f32 1.442695, %v1067_v57 }
 0x1e4   :  { %v1162_v59 = vadd.f32 1.0, %v2000_v43 }
 0x1e5   :  { %2001 = vpow2.f32 %v1100_v47  ;;  %v896_v6 = vpack.c.bf16 %v868_v7, %v867_v12 }
 0x1e6   :  { %2003 = vrcp.f32 %v1162_v59  ;;  %v730_v55 = vpop.permute.xlu1 %729  ;;  %v1205_v30 = vand.u32 2147483648, %v1162_v59  ;;  %vm1199_vm1 = vweird.f32 %v1162_v59 }
 0x1e7   :  { %v812_v24 = vmul.f32 %v2776_v61, %v730_v55  ;;  %1000 = vmatmul.bf16.gmra.mxu0 %v896_v6  ;;  %v1203_v61 = vand.u32 2147483647, %v1162_v59 }
 0x1e8   :  { %v1206_v46 = vor.u32 1.1754944e-38, %v1205_v30 }
 0x1e9   :  { %v844_v2 = vadd.f32 %v812_v24, %v2845_v8  ;;  %vm2931_vm3 = vcmp.eq.f32.partialorder %v1203_v61, 8.507059e+37 }
 0x1eb   :  { %v2002_v14 = vpop.eup %2001  ;;  %v876_v27 = vmax.f32 %v844_v2, 0.0 }
 0x1ec   :  { %v2004_v51 = vpop.eup %2003  ;;  %v1163_v9 = vadd.f32 1.0, %v2002_v14  ;;  %v1026_v16 = vpop.f32.mrf.mxu2 }
 0x1ed   :  { %v1195_v40 = vmul.f32 %v2004_v51, %v1162_v59  ;;  %v1027_v31 = vadd.f32 %v2911_v17, %v1026_v16  ;;  %v900_v33 = vpack.c.bf16 %v876_v27, %v875_v38  ;;  %vm1200_vm0 = vweird.f32 %v2004_v51 }
 0x1ee   :  { %2005 = vrcp.f32 %v1163_v9  ;;  %vm2927_vm2 = vmor %vm1199_vm1, %vm1200_vm0  ;;  %v1218_v25 = vand.u32 2147483647, %v1163_v9  ;;  %v1220_v37 = vand.u32 2147483648, %v1163_v9  ;;  %vm1214_vm5 = vweird.f32 %v1163_v9 }
 0x1ef   :  { %v1196_v11 = vsub.f32 1.0, %v1195_v40  ;;  %v1082_v36 = vsub.f32 0.0, %v1027_v31  ;;  %1020 = vmatmul.bf16.gmra.mxu1 %v900_v33 }
 0x1f0   :  { %vm1219_vm7 = vcmp.eq.f32.partialorder %v1218_v25, 8.507059e+37  ;;  %v1221_v13 = vor.u32 1.1754944e-38, %v1220_v37 }
 0x1f1   :  { %v1197_v32 = vmul.f32 %v2004_v51, %v1196_v11  ;;  %v1130_v53 = vmul.f32 1.442695, %v1082_v36 }
 0x1f3   :  { %v1198_v26 = vadd.f32 %v2004_v51, %v1197_v32  ;;  %2007 = vpow2.f32 %v1130_v53 }
 0x1f4   :  { %v2006_v8 = vpop.eup %2005  ;;  %v1028_v41 = vpop.f32.mrf.mxu2 }
 0x1f5   :  { %v1046_v20 = vpop.f32.mrf.mxu3  ;;  %v1210_v22 = vmul.f32 %v2006_v8, %v1163_v9  ;;  %v1029_v50 = vadd.f32 %v2911_v17, %v1028_v41  ;;  %v1202_v4 = vsel %vm2927_vm2, %v2004_v51, %v1198_v26  ;;  %vm1215_vm4 = vweird.f32 %v2006_v8 }
 0x1f6   :  { %v1047_v34 = vadd.f32 %v2911_v17, %v1046_v20  ;;  %v1006_v18 = vpop.f32.mrf.mxu1  ;;  %v1207_v63 = vsel %vm2931_vm3, %v1206_v46, %v1202_v4  ;;  %vm1216_vm6 = vmor %vm1214_vm5, %vm1215_vm4 }
 0x1f7   :  { %v1211_v52 = vsub.f32 1.0, %v1210_v22  ;;  %v1083_v54 = vsub.f32 0.0, %v1029_v50  ;;  %v1007_v45 = vadd.f32 %v2911_v17, %v1006_v18  ;;  %v1677_v48 = vsub.f32 1.0, %v1207_v63 }
 0x1f8   :  { %v1090_v56 = vsub.f32 0.0, %v1047_v34 }
 0x1f9   :  { %v2008_v44 = vpop.eup %2007  ;;  %v1212_v29 = vmul.f32 %v2006_v8, %v1211_v52  ;;  %v1132_v15 = vmul.f32 1.442695, %v1083_v54  ;;  %v1074_v23 = vsub.f32 0.0, %v1007_v45  ;;  %v1709_v12 = vsel %vm1676_vm8, %v1207_v63, %v1677_v48 }
 0x1fa   :  { %v1178_v58 = vadd.f32 1.0, %v2008_v44  ;;  %v1146_v10 = vmul.f32 1.442695, %v1090_v56 }
 0x1fb   :  { %v1213_v1 = vadd.f32 %v2006_v8, %v1212_v29  ;;  %2009 = vpow2.f32 %v1132_v15  ;;  %v1114_v49 = vmul.f32 1.442695, %v1074_v23 }
 0x1fc   :  { %2011 = vrcp.f32 %v1178_v58  ;;  %v1443_v51 = vand.u32 2147483647, %v1178_v58  ;;  %v1445_v9 = vand.u32 2147483648, %v1178_v58  ;;  %vm1439_vm10 = vweird.f32 %v1178_v58 }
 0x1fd   :  { %v1048_v0 = vpop.f32.mrf.mxu3  ;;  %v1217_v60 = vsel %vm1216_vm6, %v2006_v8, %v1213_v1  ;;  %2013 = vpow2.f32 %v1146_v10 }
 0x1fe   :  { %v1049_v42 = vadd.f32 %v2911_v17, %v1048_v0  ;;  %v1222_v5 = vsel %vm1219_vm7, %v1221_v13, %v1217_v60  ;;  %2015 = vpow2.f32 %v1114_v49  ;;  %v1008_v19 = vpop.f32.mrf.mxu1  ;;  %vm2964_vm11 = vcmp.eq.f32.partialorder %v1443_v51, 8.507059e+37 }
 0x1ff   :  { %v1678_v57 = vsub.f32 1.0, %v1222_v5  ;;  %v1009_v35 = vadd.f32 %v2911_v17, %v1008_v19  ;;  %v1446_v8 = vor.u32 1.1754944e-38, %v1445_v9 }
 0x200   :  { %v1091_v43 = vsub.f32 0.0, %v1049_v42 }
 0x201   :  { %v2010_v7 = vpop.eup %2009  ;;  %v1710_v47 = vsel %vm1676_vm8, %v1222_v5, %v1678_v57  ;;  %v1075_v6 = vsub.f32 0.0, %v1009_v35 }
 0x202   :  { %v1148_v59 = vmul.f32 1.442695, %v1091_v43  ;;  %v2012_v55 = vpop.eup %2011  ;;  %v1852_v3 = vpack.c.bf16 %v1710_v47, %v1709_v12  ;;  %v2950_v24 = vadd.f32 1.0, %v2010_v7 }
 0x203   :  { %v2014_v2 = vpop.eup %2013  ;;  %v1435_v14 = vmul.f32 %v2012_v55, %v1178_v58  ;;  %v1116_v38 = vmul.f32 1.442695, %v1075_v6  ;;  %vm1440_vm9 = vweird.f32 %v2012_v55 }
 0x204   :  { %2017 = vpow2.f32 %v1148_v59  ;;  %v2016_v27 = vpop.eup %2015  ;;  %1853 = vst [vmem:[%s3550_s5] sm:$0xff] %v1852_v3   ;;  %v2956_v40 = vadd.f32 1.0, %v2014_v2  ;;  %v1458_v36 = vand.u32 2147483647, %v2950_v24  ;;  %v1460_v32 = vand.u32 2147483648, %v2950_v24  ;;  %vm2968_vm12 = vmor %vm1439_vm10, %vm1440_vm9 }
 0x205   :  { %2019 = vrcp.f32 %v2950_v24  ;;  %v1436_v16 = vsub.f32 1.0, %v1435_v14  ;;  %v2958_v31 = vadd.f32 1.0, %v2016_v27  ;;  %vm1454_vm13 = vweird.f32 %v2950_v24 }
 0x206   :  { %2021 = vpow2.f32 %v1116_v38  ;;  %v1011_v33 = vpop.f32.mrf.mxu1  ;;  %v1563_v20 = vand.u32 2147483647, %v2956_v40  ;;  %v1565_v22 = vand.u32 2147483648, %v2956_v40  ;;  %vm2982_vm14 = vcmp.eq.f32.partialorder %v1458_v36, 8.507059e+37 }
 0x207   :  { %v1437_v11 = vmul.f32 %v2012_v55, %v1436_v16  ;;  %2023 = vrcp.f32 %v2956_v40  ;;  %v1012_v62 = vadd.f32 %v2911_v17, %v1011_v33  ;;  %v1325_v18 = vand.u32 2147483648, %v2958_v31 }
 0x208   :  { %2025 = vrcp.f32 %v2958_v31  ;;  %v1461_v52 = vor.u32 1.1754944e-38, %v1460_v32  ;;  %vm1559_vm15 = vweird.f32 %v2956_v40  ;;  %vm1319_vm0 = vweird.f32 %v2958_v31 }
 0x209   :  { %v1438_v61 = vadd.f32 %v2012_v55, %v1437_v11  ;;  %v1323_v25 = vand.u32 2147483647, %v2958_v31  ;;  %vm2997_vm2 = vcmp.eq.f32.partialorder %v1563_v20, 8.507059e+37  ;;  %v1566_v15 = vor.u32 1.1754944e-38, %v1565_v22 }
 0x20a   :  { %v2018_v53 = vpop.eup %2017  ;;  %v1076_v23 = vsub.f32 0.0, %v1012_v62  ;;  %v1326_v1 = vor.u32 1.1754944e-38, %v1325_v18 }
 0x20b   :  { %v2020_v30 = vpop.eup %2019  ;;  %v2974_v50 = vadd.f32 1.0, %v2018_v53  ;;  %v1442_v28 = vsel %vm2968_vm12, %v2012_v55, %v1438_v61  ;;  %vm3006_vm4 = vcmp.eq.f32.partialorder %v1323_v25, 8.507059e+37 }
 0x20c   :  { %v2022_v21 = vpop.eup %2021  ;;  %v1450_v34 = vmul.f32 %v2020_v30, %v2950_v24  ;;  %v1447_v45 = vsel %vm2964_vm11, %v1446_v8, %v1442_v28  ;;  %vm1455_vm1 = vweird.f32 %v2020_v30  ;;  %v1118_v35 = vmul.f32 1.442695, %v1076_v23 }
 0x20d   :  { %2027 = vrcp.f32 %v2974_v50  ;;  %v2024_v54 = vpop.eup %2023  ;;  %v2992_v37 = vadd.f32 1.0, %v2022_v21  ;;  %v1578_v49 = vand.u32 2147483647, %v2974_v50  ;;  %v1693_v0 = vsub.f32 1.0, %v1447_v45  ;;  %vm1456_vm6 = vmor %vm1454_vm13, %vm1455_vm1 }
 0x20e   :  { %v1451_v46 = vsub.f32 1.0, %v1450_v34  ;;  %v2994_v56 = vpop.eup %2025  ;;  %v1555_v44 = vmul.f32 %v2024_v54, %v2956_v40  ;;  %v1031_v63 = vpop.f32.mrf.mxu2  ;;  %v1580_v60 = vand.u32 2147483648, %v2974_v50  ;;  %vm1560_vm3 = vweird.f32 %v2024_v54 }
 0x20f   :  { %v1315_v10 = vmul.f32 %v2994_v56, %v2958_v31  ;;  %v1013_v13 = vpop.f32.mrf.mxu1  ;;  %2029 = vrcp.f32 %v2992_v37  ;;  %vm1574_vm5 = vweird.f32 %v2974_v50  ;;  %v1032_v12 = vadd.f32 %v2911_v17, %v1031_v63  ;;  %vm1561_vm10 = vmor %vm1559_vm15, %vm1560_vm3 }
 0x210   :  { %v1452_v58 = vmul.f32 %v2020_v30, %v1451_v46  ;;  %v1556_v48 = vsub.f32 1.0, %v1555_v44  ;;  %v1014_v7 = vadd.f32 %v2911_v17, %v1013_v13  ;;  %vm1320_vm7 = vweird.f32 %v2994_v56 }
 0x211   :  { %v1316_v5 = vsub.f32 1.0, %v1315_v10  ;;  %vm3019_vm9 = vcmp.eq.f32.partialorder %v1578_v49, 8.507059e+37  ;;  %v1725_v3 = vsel %vm1676_vm8, %v1447_v45, %v1693_v0  ;;  %v1581_v14 = vor.u32 1.1754944e-38, %v1580_v60  ;;  %vm3033_vm11 = vmor %vm1319_vm0, %vm1320_vm7 }
 0x212   :  { %v1453_v42 = vadd.f32 %v2020_v30, %v1452_v58  ;;  %v1557_v43 = vmul.f32 %v2024_v54, %v1556_v48  ;;  %2031 = vpow2.f32 %v1118_v35  ;;  %v1077_v11 = vsub.f32 0.0, %v1014_v7 }
 0x213   :  { %v2028_v57 = vpop.eup %2027  ;;  %v1317_v59 = vmul.f32 %v2994_v56, %v1316_v5  ;;  %v1084_v36 = vsub.f32 0.0, %v1032_v12  ;;  %vm1334_vm13 = vweird.f32 %v2992_v37  ;;  %v1338_v41 = vand.u32 2147483647, %v2992_v37 }
 0x214   :  { %v1457_v47 = vsel %vm1456_vm6, %v2020_v30, %v1453_v42  ;;  %v1570_v6 = vmul.f32 %v2028_v57, %v2974_v50  ;;  %v1558_v2 = vadd.f32 %v2024_v54, %v1557_v43  ;;  %vm1575_vm12 = vweird.f32 %v2028_v57 }
 0x215   :  { %v1462_v24 = vsel %vm2982_vm14, %v1461_v52, %v1457_v47  ;;  %v1318_v27 = vadd.f32 %v2994_v56, %v1317_v59  ;;  %v2030_v9 = vpop.eup %2029  ;;  %v1340_v62 = vand.u32 2147483648, %v2992_v37  ;;  %v1120_v21 = vmul.f32 1.442695, %v1077_v11  ;;  %vm1576_vm14 = vmor %vm1574_vm5, %vm1575_vm12 }
 0x216   :  { %v1694_v38 = vsub.f32 1.0, %v1462_v24  ;;  %v1571_v51 = vsub.f32 1.0, %v1570_v6  ;;  %v1562_v16 = vsel %vm1561_vm10, %v2024_v54, %v1558_v2  ;;  %v1051_v32 = vpop.f32.mrf.mxu3  ;;  %v1033_v31 = vpop.f32.mrf.mxu2  ;;  %v1330_v30 = vmul.f32 %v2030_v9, %v2992_v37 }
 0x217   :  { %v1567_v53 = vsel %vm2997_vm2, %v1566_v15, %v1562_v16  ;;  %v1322_v61 = vsel %vm3033_vm11, %v2994_v56, %v1318_v27  ;;  %v1134_v18 = vmul.f32 1.442695, %v1084_v36  ;;  %v1034_v4 = vadd.f32 %v2911_v17, %v1033_v31 }
 0x218   :  { %v1726_v40 = vsel %vm1676_vm8, %v1462_v24, %v1694_v38  ;;  %v1572_v26 = vmul.f32 %v2028_v57, %v1571_v51  ;;  %v1701_v20 = vsub.f32 1.0, %v1567_v53  ;;  %v1327_v28 = vsel %vm3006_vm4, %v1326_v1, %v1322_v61  ;;  %v991_v52 = vpop.f32.mrf.mxu0  ;;  %v2032_v54 = vpop.eup %2031 }
 0x219   :  { %v1892_v8 = vpack.c.bf16 %v1726_v40, %v1725_v3  ;;  %v1331_v34 = vsub.f32 1.0, %v1330_v30  ;;  %vm1335_vm15 = vweird.f32 %v2030_v9  ;;  %2033 = vpow2.f32 %v1120_v21 }
 0x21a   :  { %v1573_v22 = vadd.f32 %v2028_v57, %v1572_v26  ;;  %v1052_v46 = vadd.f32 %v2911_v17, %v1051_v32  ;;  %v3060_v44 = vadd.f32 1.0, %v2032_v54  ;;  %2035 = vpow2.f32 %v1134_v18  ;;  %vm1336_vm1 = vmor %vm1334_vm13, %vm1335_vm15 }
 0x21b   :  { %1936 = vst [vmem:[%s3550_s5 + $0x40] sm:$0xff] %v1892_v8   ;;  %v1332_v56 = vmul.f32 %v2030_v9, %v1331_v34  ;;  %v1085_v29 = vsub.f32 0.0, %v1034_v4  ;;  %v992_v23 = vadd.f32 %v2911_v17, %v991_v52  ;;  %vm1339_vm0 = vcmp.eq.f32.partialorder %v1338_v41, 8.507059e+37 }
 0x21c   :  { %v1577_v45 = vsel %vm1576_vm14, %v2028_v57, %v1573_v22  ;;  %v1092_v15 = vsub.f32 0.0, %v1052_v46  ;;  %v1341_v58 = vor.u32 1.1754944e-38, %v1340_v62  ;;  %2037 = vrcp.f32 %v3060_v44 }
 0x21d   :  { %v1582_v25 = vsel %vm3019_vm9, %v1581_v14, %v1577_v45  ;;  %v1333_v63 = vadd.f32 %v2030_v9, %v1332_v56  ;;  %v1733_v10 = vsel %vm1676_vm8, %v1567_v53, %v1701_v20  ;;  %v1136_v49 = vmul.f32 1.442695, %v1085_v29 }
 0x21e   :  { %v1702_v50 = vsub.f32 1.0, %v1582_v25  ;;  %v1150_v13 = vmul.f32 1.442695, %v1092_v15  ;;  %v1685_v0 = vsub.f32 1.0, %v1327_v28  ;;  %v1068_v42 = vsub.f32 0.0, %v992_v23  ;;  %v1053_v5 = vpop.f32.mrf.mxu3 }
 0x21f   :  { %v1337_v60 = vsel %vm1336_vm1, %v2030_v9, %v1333_v63  ;;  %v2034_v19 = vpop.eup %2033  ;;  %2039 = vpow2.f32 %v1136_v49  ;;  %v1353_v37 = vand.u32 2147483647, %v3060_v44  ;;  %v1054_v59 = vadd.f32 %v2911_v17, %v1053_v5 }
 0x220   :  { %v1734_v1 = vsel %vm1676_vm8, %v1582_v25, %v1702_v50  ;;  %v1342_v57 = vsel %vm1339_vm0, %v1341_v58, %v1337_v60  ;;  %v2036_v43 = vpop.eup %2035  ;;  %v3074_v7 = vadd.f32 1.0, %v2034_v19  ;;  %2041 = vpow2.f32 %v1150_v13  ;;  %v993_v14 = vpop.f32.mrf.mxu0 }
 0x221   :  { %v1912_v48 = vpack.c.bf16 %v1734_v1, %v1733_v10  ;;  %v1686_v35 = vsub.f32 1.0, %v1342_v57  ;;  %v3077_v12 = vadd.f32 1.0, %v2036_v43  ;;  %v1102_v47 = vmul.f32 1.442695, %v1068_v42 }
 0x222   :  { %v2038_v6 = vpop.eup %2037  ;;  %v1717_v55 = vsel %vm1676_vm8, %v1327_v28, %v1685_v0  ;;  %2043 = vrcp.f32 %v3074_v7  ;;  %vm1349_vm2 = vweird.f32 %v3060_v44  ;;  %v1355_v38 = vand.u32 2147483648, %v3060_v44 }
 0x223   :  { %1940 = vst [vmem:[%s3550_s5 + $0x60] sm:$0xff] %v1912_v48   ;;  %v1718_v3 = vsel %vm1676_vm8, %v1342_v57, %v1686_v35  ;;  %v1345_v2 = vmul.f32 %v2038_v6, %v3060_v44  ;;  %2045 = vrcp.f32 %v3077_v12  ;;  %vm3092_vm3 = vcmp.eq.f32.partialorder %v1353_v37, 8.507059e+37 }
 0x224   :  { %v1872_v24 = vpack.c.bf16 %v1718_v3, %v1717_v55  ;;  %2047 = vpow2.f32 %v1102_v47  ;;  %v1093_v16 = vsub.f32 0.0, %v1054_v59  ;;  %v1368_v11 = vand.u32 2147483647, %v3074_v7 }
 0x225   :  { %v2040_v27 = vpop.eup %2039  ;;  %v1346_v51 = vsub.f32 1.0, %v1345_v2  ;;  %v1370_v36 = vand.u32 2147483648, %v3074_v7  ;;  %v994_v40 = vadd.f32 %v2911_v17, %v993_v14  ;;  %vm1350_vm4 = vweird.f32 %v2038_v6 }
 0x226   :  { %1932 = vst [vmem:[%s3550_s5 + $0x20] sm:$0xff] %v1872_v24   ;;  %v2042_v33 = vpop.eup %2041  ;;  %v3098_v32 = vadd.f32 1.0, %v2040_v27  ;;  %v1473_v61 = vand.u32 2147483647, %v3077_v12  ;;  %v1356_v8 = vor.u32 1.1754944e-38, %v1355_v38  ;;  %vm1364_vm5 = vweird.f32 %v3074_v7  ;;  %vm1351_vm6 = vmor %vm1349_vm2, %vm1350_vm4 }
 0x227   :  { %v1347_v53 = vmul.f32 %v2038_v6, %v1346_v51  ;;  %v3102_v26 = vadd.f32 1.0, %v2042_v33  ;;  %v1475_v30 = vand.u32 2147483648, %v3077_v12  ;;  %v1152_v22 = vmul.f32 1.442695, %v1093_v16 }
 0x228   :  { %v2044_v31 = vpop.eup %2043  ;;  %2049 = vrcp.f32 %v3098_v32  ;;  %vm3111_vm7 = vcmp.eq.f32.partialorder %v1368_v11, 8.507059e+37  ;;  %v1371_v28 = vor.u32 1.1754944e-38, %v1370_v36  ;;  %vm1469_vm9 = vweird.f32 %v3077_v12 }
 0x229   :  { %v1348_v41 = vadd.f32 %v2038_v6, %v1347_v53  ;;  %v1360_v20 = vmul.f32 %v2044_v31, %v3074_v7  ;;  %2051 = vrcp.f32 %v3102_v26  ;;  %v2046_v62 = vpop.eup %2045  ;;  %v1490_v34 = vand.u32 2147483648, %v3098_v32 }
 0x22a   :  { %v2048_v18 = vpop.eup %2047  ;;  %v1465_v54 = vmul.f32 %v2046_v62, %v3077_v12  ;;  %vm3118_vm10 = vcmp.eq.f32.partialorder %v1473_v61, 8.507059e+37  ;;  %v1069_v46 = vsub.f32 0.0, %v994_v40  ;;  %vm1365_vm11 = vweird.f32 %v2044_v31 }
 0x22b   :  { %v1352_v4 = vsel %vm1351_vm6, %v2038_v6, %v1348_v41  ;;  %v1361_v52 = vsub.f32 1.0, %v1360_v20  ;;  %v1476_v56 = vor.u32 1.1754944e-38, %v1475_v30  ;;  %v3124_v44 = vadd.f32 1.0, %v2048_v18  ;;  %vm1366_vm14 = vmor %vm1364_vm5, %vm1365_vm11 }
 0x22c   :  { %v1357_v25 = vsel %vm3092_vm3, %v1356_v8, %v1352_v4  ;;  %v1466_v15 = vsub.f32 1.0, %v1465_v54  ;;  %2053 = vpow2.f32 %v1152_v22  ;;  %vm1484_vm12 = vweird.f32 %v3098_v32 }
 0x22d   :  { %v1687_v50 = vsub.f32 1.0, %v1357_v25  ;;  %v1362_v29 = vmul.f32 %v2044_v31, %v1361_v52  ;;  %v1488_v63 = vand.u32 2147483647, %v3098_v32  ;;  %v1491_v58 = vor.u32 1.1754944e-38, %v1490_v34 }
 0x22e   :  { %v2050_v23 = vpop.eup %2049  ;;  %2055 = vrcp.f32 %v3124_v44  ;;  %v1467_v49 = vmul.f32 %v2046_v62, %v1466_v15  ;;  %vm1470_vm13 = vweird.f32 %v2046_v62  ;;  %vm1589_vm15 = vweird.f32 %v3102_v26 }
 0x22f   :  { %v2052_v10 = vpop.eup %2051  ;;  %v1363_v1 = vadd.f32 %v2044_v31, %v1362_v29  ;;  %v1480_v13 = vmul.f32 %v2050_v23, %v3098_v32  ;;  %v1593_v60 = vand.u32 2147483647, %v3102_v26  ;;  %v1595_v42 = vand.u32 2147483648, %v3102_v26  ;;  %vm1471_vm0 = vmor %vm1469_vm9, %vm1470_vm13 }
 0x230   :  { %v1585_v48 = vmul.f32 %v2052_v10, %v3102_v26  ;;  %v1719_v5 = vsel %vm1676_vm8, %v1357_v25, %v1687_v50  ;;  %v1468_v57 = vadd.f32 %v2046_v62, %v1467_v49  ;;  %vm1485_vm1 = vweird.f32 %v2050_v23 }
 0x231   :  { %v1056_v0 = vpop.f32.mrf.mxu3  ;;  %v1367_v19 = vsel %vm1366_vm14, %v2044_v31, %v1363_v1  ;;  %v1481_v43 = vsub.f32 1.0, %v1480_v13  ;;  %v1104_v37 = vmul.f32 1.442695, %v1069_v46  ;;  %vm1590_vm2 = vweird.f32 %v2052_v10  ;;  %vm1486_vm3 = vmor %vm1484_vm12, %vm1485_vm1 }
 0x232   :  { %v1372_v35 = vsel %vm3111_vm7, %v1371_v28, %v1367_v19  ;;  %v1586_v7 = vsub.f32 1.0, %v1585_v48  ;;  %v2054_v47 = vpop.eup %2053  ;;  %v1472_v6 = vsel %vm1471_vm0, %v2046_v62, %v1468_v57  ;;  %v1057_v51 = vadd.f32 %v2911_v17, %v1056_v0  ;;  %vm3161_vm5 = vmor %vm1589_vm15, %vm1590_vm2 }
 0x233   :  { %v1688_v59 = vsub.f32 1.0, %v1372_v35  ;;  %v1482_v55 = vmul.f32 %v2050_v23, %v1481_v43  ;;  %v1477_v24 = vsel %vm3118_vm10, %v1476_v56, %v1472_v6  ;;  %v3147_v14 = vadd.f32 1.0, %v2054_v47 }
 0x234   :  { %v3143_v3 = vpop.eup %2055  ;;  %v1587_v2 = vmul.f32 %v2052_v10, %v1586_v7  ;;  %2057 = vpow2.f32 %v1104_v37  ;;  %v1695_v16 = vsub.f32 1.0, %v1477_v24  ;;  %vm1489_vm4 = vcmp.eq.f32.partialorder %v1488_v63, 8.507059e+37 }
 0x235   :  { %v1720_v12 = vsel %vm1676_vm8, %v1372_v35, %v1688_v59  ;;  %v1483_v38 = vadd.f32 %v2050_v23, %v1482_v55  ;;  %v1225_v27 = vmul.f32 %v3143_v3, %v3124_v44  ;;  %2059 = vrcp.f32 %v3147_v14 }
 0x236   :  { %v1877_v9 = vpack.c.bf16 %v1720_v12, %v1719_v5  ;;  %v1588_v33 = vadd.f32 %v2052_v10, %v1587_v2  ;;  %vm1594_vm6 = vcmp.eq.f32.partialorder %v1593_v60, 8.507059e+37  ;;  %v1596_v30 = vor.u32 1.1754944e-38, %v1595_v42 }
 0x237   :  { %v1487_v36 = vsel %vm1486_vm3, %v2050_v23, %v1483_v38  ;;  %v1226_v61 = vsub.f32 1.0, %v1225_v27  ;;  %v1233_v41 = vand.u32 2147483647, %v3124_v44  ;;  %v1094_v26 = vsub.f32 0.0, %v1057_v51 }
 0x238   :  { %v1036_v11 = vpop.f32.mrf.mxu2  ;;  %1933 = vst [vmem:[%s3550_s5 + $0x28] sm:$0xff] %v1877_v9   ;;  %v1492_v53 = vsel %vm1489_vm4, %v1491_v58, %v1487_v36  ;;  %v1592_v32 = vsel %vm3161_vm5, %v2052_v10, %v1588_v33  ;;  %v1727_v62 = vsel %vm1676_vm8, %v1477_v24, %v1695_v16  ;;  %v1235_v21 = vand.u32 2147483648, %v3124_v44 }
 0x239   :  { %v1696_v8 = vsub.f32 1.0, %v1492_v53  ;;  %v1058_v20 = vpop.f32.mrf.mxu3  ;;  %v1608_v28 = vand.u32 2147483647, %v3147_v14  ;;  %v1037_v34 = vadd.f32 %v2911_v17, %v1036_v11  ;;  %v1597_v4 = vsel %vm1594_vm6, %v1596_v30, %v1592_v32 }
 0x23a   :  { %v996_v31 = vpop.f32.mrf.mxu0  ;;  %v2058_v22 = vpop.eup %2057  ;;  %v1154_v54 = vmul.f32 1.442695, %v1094_v26  ;;  %v1227_v25 = vmul.f32 %v3143_v3, %v1226_v61  ;;  %v1059_v50 = vadd.f32 %v2911_v17, %v1058_v20  ;;  %vm1229_vm7 = vweird.f32 %v3124_v44 }
 0x23b   :  { %v1728_v18 = vsel %vm1676_vm8, %v1492_v53, %v1696_v8  ;;  %v3178_v52 = vadd.f32 1.0, %v2058_v22  ;;  %v2060_v45 = vpop.eup %2059  ;;  %v1086_v56 = vsub.f32 0.0, %v1037_v34  ;;  %vm1230_vm9 = vweird.f32 %v3143_v3 }
 0x23c   :  { %v1897_v46 = vpack.c.bf16 %v1728_v18, %v1727_v62  ;;  %v1600_v29 = vmul.f32 %v2060_v45, %v3147_v14  ;;  %vm3189_vm10 = vcmp.eq.f32.partialorder %v1233_v41, 8.507059e+37  ;;  %v1236_v23 = vor.u32 1.1754944e-38, %v1235_v21  ;;  %vm3210_vm14 = vmor %vm1229_vm7, %vm1230_vm9 }
 0x23d   :  { %2061 = vrcp.f32 %v3178_v52  ;;  %vm1604_vm11 = vweird.f32 %v3147_v14  ;;  %v1610_v63 = vand.u32 2147483648, %v3147_v14  ;;  %v1703_v10 = vsub.f32 1.0, %v1597_v4 }
 0x23e   :  { %1937 = vst [vmem:[%s3550_s5 + $0x48] sm:$0xff] %v1897_v46   ;;  %v1601_v1 = vsub.f32 1.0, %v1600_v29  ;;  %2063 = vpow2.f32 %v1154_v54  ;;  %v1138_v49 = vmul.f32 1.442695, %v1086_v56  ;;  %v1228_v13 = vadd.f32 %v3143_v3, %v1227_v25 }
 0x23f   :  { %vm3196_vm12 = vcmp.eq.f32.partialorder %v1608_v28, 8.507059e+37  ;;  %v1095_v48 = vsub.f32 0.0, %v1059_v50  ;;  %v997_v60 = vadd.f32 %v2911_v17, %v996_v31  ;;  %vm1605_vm13 = vweird.f32 %v2060_v45 }
 0x240   :  { %v1038_v58 = vpop.f32.mrf.mxu2  ;;  %v1602_v19 = vmul.f32 %v2060_v45, %v1601_v1  ;;  %2065 = vpow2.f32 %v1138_v49  ;;  %v1735_v59 = vsel %vm1676_vm8, %v1597_v4, %v1703_v10  ;;  %v1611_v24 = vor.u32 1.1754944e-38, %v1610_v63  ;;  %vm1606_vm15 = vmor %vm1604_vm11, %vm1605_vm13 }
 0x241   :  { %v1039_v57 = vadd.f32 %v2911_v17, %v1038_v58  ;;  %v1156_v43 = vmul.f32 1.442695, %v1095_v48  ;;  %v1070_v35 = vsub.f32 0.0, %v997_v60  ;;  %v1232_v12 = vsel %vm3210_vm14, %v3143_v3, %v1228_v13 }
 0x242   :  { %v998_v42 = vpop.f32.mrf.mxu0  ;;  %v1016_v5 = vpop.f32.mrf.mxu1  ;;  %v1603_v55 = vadd.f32 %v2060_v45, %v1602_v19  ;;  %v1237_v14 = vsel %vm3189_vm10, %v1236_v23, %v1232_v12  ;;  %v1248_v32 = vand.u32 2147483647, %v3178_v52  ;;  %v1250_v61 = vand.u32 2147483648, %v3178_v52 }
 0x243   :  { %v999_v7 = vadd.f32 %v2911_v17, %v998_v42  ;;  %v1017_v37 = vadd.f32 %v2911_v17, %v1016_v5  ;;  %v2062_v47 = vpop.eup %2061  ;;  %v1087_v2 = vsub.f32 0.0, %v1039_v57  ;;  %2067 = vpow2.f32 %v1156_v43 }
 0x244   :  { %v1240_v38 = vmul.f32 %v2062_v47, %v3178_v52  ;;  %v1106_v27 = vmul.f32 1.442695, %v1070_v35  ;;  %v2064_v51 = vpop.eup %2063  ;;  %v1607_v44 = vsel %vm1606_vm15, %v2060_v45, %v1603_v55  ;;  %vm1245_vm0 = vweird.f32 %v2062_v47 }
 0x245   :  { %v1140_v9 = vmul.f32 1.442695, %v1087_v2  ;;  %v1071_v16 = vsub.f32 0.0, %v999_v7  ;;  %v1078_v33 = vsub.f32 0.0, %v1017_v37  ;;  %v1612_v11 = vsel %vm3196_vm12, %v1611_v24, %v1607_v44 }
 0x246   :  { %v1241_v36 = vsub.f32 1.0, %v1240_v38  ;;  %v3222_v40 = vadd.f32 1.0, %v2064_v51  ;;  %2069 = vpow2.f32 %v1106_v27  ;;  %v2066_v3 = vpop.eup %2065  ;;  %v1704_v53 = vsub.f32 1.0, %v1612_v11 }
 0x247   :  { %v1108_v8 = vmul.f32 1.442695, %v1071_v16  ;;  %vm1244_vm1 = vweird.f32 %v3178_v52  ;;  %v3232_v41 = vadd.f32 1.0, %v2066_v3  ;;  %v1122_v26 = vmul.f32 1.442695, %v1078_v33 }
 0x248   :  { %v1242_v31 = vmul.f32 %v2062_v47, %v1241_v36  ;;  %2071 = vrcp.f32 %v3222_v40  ;;  %v1736_v30 = vsel %vm1676_vm8, %v1612_v11, %v1704_v53  ;;  %v1679_v22 = vsub.f32 1.0, %v1237_v14  ;;  %vm1246_vm2 = vmor %vm1244_vm1, %vm1245_vm0 }
 0x249   :  { %v2068_v20 = vpop.eup %2067  ;;  %v1917_v62 = vpack.c.bf16 %v1736_v30, %v1735_v59  ;;  %2073 = vpow2.f32 %v1140_v9  ;;  %vm1249_vm3 = vcmp.eq.f32.partialorder %v1248_v32, 8.507059e+37  ;;  %v1251_v28 = vor.u32 1.1754944e-38, %v1250_v61 }
 0x24a   :  { %v1243_v21 = vadd.f32 %v2062_v47, %v1242_v31  ;;  %v1623_v34 = vand.u32 2147483647, %v3222_v40  ;;  %2075 = vrcp.f32 %v3232_v41  ;;  %v1625_v52 = vand.u32 2147483648, %v3222_v40  ;;  %v1018_v58 = vpop.f32.mrf.mxu1 }
 0x24b   :  { %1941 = vst [vmem:[%s3550_s5 + $0x68] sm:$0xff] %v1917_v62   ;;  %v3240_v54 = vadd.f32 1.0, %v2068_v20  ;;  %2077 = vpow2.f32 %v1108_v8  ;;  %v1711_v56 = vsel %vm1676_vm8, %v1237_v14, %v1679_v22  ;;  %v1503_v29 = vand.u32 2147483647, %v3232_v41 }
 0x24c   :  { %v2070_v18 = vpop.eup %2069  ;;  %v1247_v4 = vsel %vm1246_vm2, %v2062_v47, %v1243_v21  ;;  %2079 = vpow2.f32 %v1122_v26  ;;  %vm1619_vm4 = vweird.f32 %v3222_v40  ;;  %vm3250_vm5 = vcmp.eq.f32.partialorder %v1623_v34, 8.507059e+37 }
 0x24d   :  { %v1252_v45 = vsel %vm1249_vm3, %v1251_v28, %v1247_v4  ;;  %v3242_v46 = vadd.f32 1.0, %v2070_v18  ;;  %2081 = vrcp.f32 %v3240_v54  ;;  %v1505_v63 = vand.u32 2147483648, %v3232_v41 }
 0x24e   :  { %v2072_v25 = vpop.eup %2071  ;;  %v1680_v50 = vsub.f32 1.0, %v1252_v45  ;;  %v1626_v49 = vor.u32 1.1754944e-38, %v1625_v52  ;;  %v1640_v13 = vand.u32 2147483648, %v3240_v54  ;;  %vm1499_vm6 = vweird.f32 %v3232_v41 }
 0x24f   :  { %v1615_v15 = vmul.f32 %v2072_v25, %v3222_v40  ;;  %v2074_v10 = vpop.eup %2073  ;;  %2083 = vrcp.f32 %v3242_v46  ;;  %v1638_v42 = vand.u32 2147483647, %v3240_v54  ;;  %vm3262_vm7 = vcmp.eq.f32.partialorder %v1503_v29, 8.507059e+37  ;;  %v3302_v40 = vld [vmem:[%s3549_s4] ss:$0 sm:$0xff] }
 0x250   :  { %v1712_v1 = vsel %vm1676_vm8, %v1252_v45, %v1680_v50  ;;  %v2076_v0 = vpop.eup %2075  ;;  %v1265_v43 = vand.u32 2147483648, %v3242_v46  ;;  %v3268_v35 = vadd.f32 %v2911_v17, %v1018_v58  ;;  %vm1620_vm9 = vweird.f32 %v2072_v25 }
 0x251   :  { %v1857_v48 = vpack.c.bf16 %v1712_v1, %v1711_v56  ;;  %v1616_v60 = vsub.f32 1.0, %v1615_v15  ;;  %v2078_v5 = vpop.eup %2077  ;;  %v1495_v19 = vmul.f32 %v2076_v0, %v3232_v41  ;;  %v1506_v47 = vor.u32 1.1754944e-38, %v1505_v63  ;;  %vm1621_vm13 = vmor %vm1619_vm4, %vm1620_vm9 }
 0x252   :  { %v2080_v7 = vpop.eup %2079  ;;  %v3273_v59 = vadd.f32 1.0, %v2074_v10  ;;  %vm1634_vm10 = vweird.f32 %v3240_v54  ;;  %v1641_v24 = vor.u32 1.1754944e-38, %v1640_v13  ;;  %v1263_v2 = vand.u32 2147483647, %v3242_v46 }
 0x253   :  { %1929 = vst [vmem:[%s3550_s5 + $0x8] sm:$0xff] %v1857_v48   ;;  %v1617_v37 = vmul.f32 %v2072_v25, %v1616_v60  ;;  %v2082_v6 = vpop.eup %2081  ;;  %v1496_v55 = vsub.f32 1.0, %v1495_v19  ;;  %vm3278_vm11 = vcmp.eq.f32.partialorder %v1638_v42, 8.507059e+37  ;;  %vm1259_vm12 = vweird.f32 %v3242_v46  ;;  %v1041_v51 = vpop.f32.mrf.mxu2 }
 0x254   :  { %v1630_v17 = vmul.f32 %v2082_v6, %v3240_v54  ;;  %2085 = vrcp.f32 %v3273_v59  ;;  %v3284_v27 = vadd.f32 1.0, %v2078_v5  ;;  %vm1500_vm14 = vweird.f32 %v2076_v0 }
 0x255   :  { %v1618_v12 = vadd.f32 %v2072_v25, %v1617_v37  ;;  %v2084_v44 = vpop.eup %2083  ;;  %v1497_v9 = vmul.f32 %v2076_v0, %v1496_v55  ;;  %v1266_v16 = vor.u32 1.1754944e-38, %v1265_v43  ;;  %v3289_v33 = vadd.f32 1.0, %v2080_v7  ;;  %vm1501_vm1 = vmor %vm1499_vm6, %vm1500_vm14 }
 0x256   :  { %v1631_v36 = vsub.f32 1.0, %v1630_v17  ;;  %v1255_v3 = vmul.f32 %v2084_v44, %v3242_v46  ;;  %v1079_v14 = vsub.f32 0.0, %v3268_v35  ;;  %vm1635_vm15 = vweird.f32 %v2082_v6 }
 0x257   :  { %v1622_v11 = vsel %vm1621_vm13, %v2072_v25, %v1618_v12  ;;  %v1498_v32 = vadd.f32 %v2076_v0, %v1497_v9  ;;  %vm3295_vm0 = vcmp.eq.f32.partialorder %v1263_v2, 8.507059e+37  ;;  %v3305_v31 = vadd.f32 %v3302_v40, %v1041_v51  ;;  %vm1636_vm4 = vmor %vm1634_vm10, %vm1635_vm15 }
 0x258   :  { %v1627_v53 = vsel %vm3250_vm5, %v1626_v49, %v1622_v11  ;;  %v1632_v8 = vmul.f32 %v2082_v6, %v1631_v36  ;;  %v1256_v30 = vsub.f32 1.0, %v1255_v3  ;;  %v1518_v26 = vand.u32 2147483647, %v3273_v59 }
 0x259   :  { %2087 = vrcp.f32 %v3284_v27  ;;  %v1502_v20 = vsel %vm1501_vm1, %v2076_v0, %v1498_v32  ;;  %vm1260_vm2 = vweird.f32 %v2084_v44  ;;  %vm1514_vm3 = vweird.f32 %v3273_v59 }
 0x25a   :  { %v1520_v22 = vand.u32 2147483648, %v3273_v59  ;;  %v2086_v62 = vpop.eup %2085  ;;  %v1705_v21 = vsub.f32 1.0, %v1627_v53  ;;  %v1507_v28 = vsel %vm3262_vm7, %v1506_v47, %v1502_v20  ;;  %v1633_v34 = vadd.f32 %v2082_v6, %v1632_v8  ;;  %vm3331_vm6 = vmor %vm1259_vm12, %vm1260_vm2 }
 0x25b   :  { %v1257_v41 = vmul.f32 %v2084_v44, %v1256_v30  ;;  %v1697_v18 = vsub.f32 1.0, %v1507_v28  ;;  %v1510_v4 = vmul.f32 %v2086_v62, %v3273_v59  ;;  %v1278_v52 = vand.u32 2147483647, %v3284_v27  ;;  %v1043_v60 = vpop.f32.mrf.mxu2 }
 0x25c   :  { %v1280_v45 = vand.u32 2147483648, %v3284_v27  ;;  %v1637_v25 = vsel %vm1636_vm4, %v2082_v6, %v1633_v34  ;;  %vm3321_vm5 = vcmp.eq.f32.partialorder %v1518_v26, 8.507059e+37  ;;  %2089 = vrcp.f32 %v3289_v33 }
 0x25d   :  { %v1258_v56 = vadd.f32 %v2084_v44, %v1257_v41  ;;  %v1642_v29 = vsel %vm3278_vm11, %v1641_v24, %v1637_v25  ;;  %v1511_v15 = vsub.f32 1.0, %v1510_v4  ;;  %v1521_v23 = vor.u32 1.1754944e-38, %v1520_v22 }
 0x25e   :  { %vm1274_vm7 = vweird.f32 %v3284_v27  ;;  %v1737_v58 = vsel %vm1676_vm8, %v1627_v53, %v1705_v21  ;;  %v1706_v10 = vsub.f32 1.0, %v1642_v29  ;;  %vm1515_vm9 = vweird.f32 %v2086_v62 }
 0x25f   :  { %v2088_v63 = vpop.eup %2087  ;;  %v1262_v1 = vsel %vm3331_vm6, %v2084_v44, %v1258_v56  ;;  %v1729_v46 = vsel %vm1676_vm8, %v1507_v28, %v1697_v18  ;;  %v1512_v49 = vmul.f32 %v2086_v62, %v1511_v15  ;;  %vm3343_vm10 = vcmp.eq.f32.partialorder %v1278_v52, 8.507059e+37  ;;  %vm1516_vm12 = vmor %vm1514_vm3, %vm1515_vm9 }
 0x260   :  { %v1270_v13 = vmul.f32 %v2088_v63, %v3284_v27  ;;  %v1281_v48 = vor.u32 1.1754944e-38, %v1280_v45  ;;  %v1738_v5 = vsel %vm1676_vm8, %v1642_v29, %v1706_v10  ;;  %v1267_v19 = vsel %vm3295_vm0, %v1266_v16, %v1262_v1 }
 0x261   :  { %v1383_v57 = vand.u32 2147483647, %v3289_v33  ;;  %v1385_v43 = vand.u32 2147483648, %v3289_v33  ;;  %v1922_v35 = vpack.c.bf16 %v1738_v5, %v1737_v58  ;;  %v1513_v7 = vadd.f32 %v2086_v62, %v1512_v49 }
 0x262   :  { %v1061_v42 = vpop.f32.mrf.mxu3  ;;  %v1271_v37 = vsub.f32 1.0, %v1270_v13  ;;  %vm1379_vm11 = vweird.f32 %v3289_v33  ;;  %v1124_v47 = vmul.f32 1.442695, %v1079_v14  ;;  %v2090_v55 = vpop.eup %2089  ;;  %vm1275_vm13 = vweird.f32 %v2088_v63 }
 0x263   :  { %v1088_v24 = vsub.f32 0.0, %v3305_v31  ;;  %v1044_v2 = vadd.f32 %v3302_v40, %v1043_v60  ;;  %v1062_v12 = vadd.f32 %v3302_v40, %v1061_v42  ;;  %1942 = vst [vmem:[%s3550_s5 + $0x70] sm:$0xff] %v1922_v35   ;;  %v1681_v17 = vsub.f32 1.0, %v1267_v19  ;;  %vm1276_vm14 = vmor %vm1274_vm7, %vm1275_vm13 }
 0x264   :  { %v1001_v6 = vpop.f32.mrf.mxu0  ;;  %v1517_v38 = vsel %vm1516_vm12, %v2086_v62, %v1513_v7  ;;  %v1272_v51 = vmul.f32 %v2088_v63, %v1271_v37  ;;  %v1375_v44 = vmul.f32 %v2090_v55, %v3289_v33  ;;  %2091 = vpow2.f32 %v1124_v47 }
 0x265   :  { %v1522_v59 = vsel %vm3321_vm5, %v1521_v23, %v1517_v38  ;;  %v1142_v9 = vmul.f32 1.442695, %v1088_v24  ;;  %v1089_v16 = vsub.f32 0.0, %v1044_v2  ;;  %v1096_v14 = vsub.f32 0.0, %v1062_v12 }
 0x266   :  { %v1698_v11 = vsub.f32 1.0, %v1522_v59  ;;  %v1273_v36 = vadd.f32 %v2088_v63, %v1272_v51  ;;  %v1376_v3 = vsub.f32 1.0, %v1375_v44  ;;  %vm1380_vm15 = vweird.f32 %v2090_v55 }
 0x267   :  { %2093 = vpow2.f32 %v1142_v9  ;;  %v1144_v53 = vmul.f32 1.442695, %v1089_v16  ;;  %v1002_v32 = vadd.f32 %v3302_v40, %v1001_v6  ;;  %v1158_v30 = vmul.f32 1.442695, %v1096_v14  ;;  %vm3383_vm0 = vmor %vm1379_vm11, %vm1380_vm15 }
 0x268   :  { %v1730_v61 = vsel %vm1676_vm8, %v1522_v59, %v1698_v11  ;;  %v1277_v31 = vsel %vm1276_vm14, %v2088_v63, %v1273_v36  ;;  %v1377_v8 = vmul.f32 %v2090_v55, %v1376_v3  ;;  %v1713_v18 = vsel %vm1676_vm8, %v1267_v19, %v1681_v17 }
 0x269   :  { %v1902_v20 = vpack.c.bf16 %v1730_v61, %v1729_v46  ;;  %v1282_v22 = vsel %vm3343_vm10, %v1281_v48, %v1277_v31  ;;  %2095 = vpow2.f32 %v1144_v53  ;;  %v1072_v62 = vsub.f32 0.0, %v1002_v32 }
 0x26a   :  { %v1063_v26 = vpop.f32.mrf.mxu3  ;;  %v1682_v27 = vsub.f32 1.0, %v1282_v22  ;;  %v1378_v21 = vadd.f32 %v2090_v55, %v1377_v8  ;;  %2097 = vpow2.f32 %v1158_v30  ;;  %v2092_v41 = vpop.eup %2091  ;;  %v1386_v23 = vor.u32 1.1754944e-38, %v1385_v43 }
 0x26b   :  { %v1064_v28 = vadd.f32 %v3302_v40, %v1063_v26  ;;  %1938 = vst [vmem:[%s3550_s5 + $0x50] sm:$0xff] %v1902_v20   ;;  %v1110_v52 = vmul.f32 1.442695, %v1072_v62  ;;  %v3392_v50 = vadd.f32 1.0, %v2092_v41  ;;  %vm1384_vm1 = vcmp.eq.f32.partialorder %v1383_v57, 8.507059e+37 }
 0x26c   :  { %v1003_v34 = vpop.f32.mrf.mxu0  ;;  %v1714_v25 = vsel %vm1676_vm8, %v1282_v22, %v1682_v27  ;;  %v1382_v56 = vsel %vm3383_vm0, %v2090_v55, %v1378_v21  ;;  %v1021_v46 = vpop.f32.mrf.mxu1 }
 0x26d   :  { %v1004_v45 = vadd.f32 %v3302_v40, %v1003_v34  ;;  %v1097_v29 = vsub.f32 0.0, %v1064_v28  ;;  %v2094_v54 = vpop.eup %2093  ;;  %v1862_v15 = vpack.c.bf16 %v1714_v25, %v1713_v18  ;;  %2099 = vpow2.f32 %v1110_v52 }
 0x26e   :  { %2101 = vrcp.f32 %v3392_v50  ;;  %v1387_v58 = vsel %vm1384_vm1, %v1386_v23, %v1382_v56  ;;  %v3398_v10 = vadd.f32 1.0, %v2094_v54  ;;  %v3405_v60 = vadd.f32 %v3302_v40, %v1021_v46 }
 0x26f   :  { %v1073_v33 = vsub.f32 0.0, %v1004_v45  ;;  %v2096_v63 = vpop.eup %2095  ;;  %1930 = vst [vmem:[%s3550_s5 + $0x10] sm:$0xff] %v1862_v15   ;;  %v1160_v1 = vmul.f32 1.442695, %v1097_v29  ;;  %v1689_v48 = vsub.f32 1.0, %v1387_v58  ;;  %v1400_v19 = vand.u32 2147483648, %v3392_v50 }
 0x270   :  { %v2098_v49 = vpop.eup %2097  ;;  %v3400_v13 = vadd.f32 1.0, %v2096_v63  ;;  %2103 = vrcp.f32 %v3398_v10  ;;  %v1398_v5 = vand.u32 2147483647, %v3392_v50  ;;  %v1533_v35 = vand.u32 2147483647, %v3398_v10 }
 0x271   :  { %v1112_v0 = vmul.f32 1.442695, %v1073_v33  ;;  %v3409_v57 = vadd.f32 1.0, %v2098_v49  ;;  %v1535_v7 = vand.u32 2147483648, %v3398_v10  ;;  %v3421_v24 = vsel %vm1676_vm8, %v1387_v58, %v1689_v48 }
 0x272   :  { %2105 = vrcp.f32 %v3400_v13  ;;  %v1548_v6 = vand.u32 2147483647, %v3400_v13  ;;  %v1550_v55 = vand.u32 2147483648, %v3400_v13  ;;  %vm1394_vm2 = vweird.f32 %v3392_v50 }
 0x273   :  { %v2100_v42 = vpop.eup %2099  ;;  %2107 = vpow2.f32 %v1160_v1  ;;  %v1080_v2 = vsub.f32 0.0, %v3405_v60  ;;  %vm3426_vm3 = vcmp.eq.f32.partialorder %v1398_v5, 8.507059e+37  ;;  %v1401_v51 = vor.u32 1.1754944e-38, %v1400_v19 }
 0x274   :  { %v2102_v43 = vpop.eup %2101  ;;  %v3413_v37 = vadd.f32 1.0, %v2100_v42  ;;  %2109 = vpow2.f32 %v1112_v0  ;;  %vm1529_vm4 = vweird.f32 %v3398_v10  ;;  %vm3432_vm5 = vcmp.eq.f32.partialorder %v1533_v35, 8.507059e+37  ;;  %v1023_v46 = vpop.f32.mrf.mxu1 }
 0x275   :  { %v1390_v47 = vmul.f32 %v2102_v43, %v3392_v50  ;;  %2111 = vrcp.f32 %v3409_v57  ;;  %v1536_v16 = vor.u32 1.1754944e-38, %v1535_v7  ;;  %vm1544_vm6 = vweird.f32 %v3400_v13 }
 0x276   :  { %2113 = vrcp.f32 %v3413_v37  ;;  %v2104_v12 = vpop.eup %2103  ;;  %vm1395_vm7 = vweird.f32 %v2102_v43  ;;  %vm3438_vm9 = vcmp.eq.f32.partialorder %v1548_v6, 8.507059e+37  ;;  %v1551_v53 = vor.u32 1.1754944e-38, %v1550_v55 }
 0x277   :  { %v1391_v17 = vsub.f32 1.0, %v1390_v47  ;;  %v1525_v59 = vmul.f32 %v2104_v12, %v3398_v10  ;;  %vm1649_vm10 = vweird.f32 %v3409_v57  ;;  %v1653_v31 = vand.u32 2147483647, %v3409_v57  ;;  %vm1396_vm12 = vmor %vm1394_vm2, %vm1395_vm7 }
 0x278   :  { %v2106_v44 = vpop.eup %2105  ;;  %v1655_v8 = vand.u32 2147483648, %v3409_v57  ;;  %vm1530_vm11 = vweird.f32 %v2104_v12  ;;  %v1293_v62 = vand.u32 2147483647, %v3413_v37  ;;  %vm1289_vm14 = vweird.f32 %v3413_v37 }
 0x279   :  { %v2108_v11 = vpop.eup %2107  ;;  %v1392_v36 = vmul.f32 %v2102_v43, %v1391_v17  ;;  %v1540_v3 = vmul.f32 %v2106_v44, %v3400_v13  ;;  %v1526_v61 = vsub.f32 1.0, %v1525_v59  ;;  %vm1545_vm13 = vweird.f32 %v2106_v44  ;;  %vm1531_vm15 = vmor %vm1529_vm4, %vm1530_vm11 }
 0x27a   :  { %v2110_v32 = vpop.eup %2109  ;;  %v3445_v30 = vadd.f32 1.0, %v2108_v11  ;;  %v1295_v56 = vand.u32 2147483648, %v3413_v37  ;;  %v1656_v54 = vor.u32 1.1754944e-38, %v1655_v8  ;;  %vm1546_vm0 = vmor %vm1544_vm6, %vm1545_vm13  ;;  %v1024_v6 = vadd.f32 %v3302_v40, %v1023_v46 }
 0x27b   :  { %v2112_v26 = vpop.eup %2111  ;;  %v1393_v20 = vadd.f32 %v2102_v43, %v1392_v36  ;;  %v1541_v22 = vsub.f32 1.0, %v1540_v3  ;;  %v1527_v21 = vmul.f32 %v2104_v12, %v1526_v61  ;;  %v3455_v34 = vadd.f32 1.0, %v2110_v32 }
 0x27c   :  { %v3448_v27 = vpop.eup %2113  ;;  %v1645_v28 = vmul.f32 %v2112_v26, %v3409_v57  ;;  %2115 = vrcp.f32 %v3445_v30  ;;  %vm1650_vm1 = vweird.f32 %v2112_v26  ;;  %v1668_v47 = vand.u32 2147483647, %v3445_v30 }
 0x27d   :  { %v1397_v41 = vsel %vm1396_vm12, %v2102_v43, %v1393_v20  ;;  %v1542_v18 = vmul.f32 %v2106_v44, %v1541_v22  ;;  %v1285_v4 = vmul.f32 %v3448_v27, %v3413_v37  ;;  %v1528_v45 = vadd.f32 %v2104_v12, %v1527_v21  ;;  %vm3479_vm2 = vmor %vm1649_vm10, %vm1650_vm1 }
 0x27e   :  { %v1402_v52 = vsel %vm3426_vm3, %v1401_v51, %v1397_v41  ;;  %v1646_v25 = vsub.f32 1.0, %v1645_v28  ;;  %2117 = vrcp.f32 %v3455_v34  ;;  %vm1290_vm3 = vweird.f32 %v3448_v27 }
 0x27f   :  { %v1690_v50 = vsub.f32 1.0, %v1402_v52  ;;  %v1543_v29 = vadd.f32 %v2106_v44, %v1542_v18  ;;  %v1286_v15 = vsub.f32 1.0, %v1285_v4  ;;  %v1532_v23 = vsel %vm1531_vm15, %v2104_v12, %v1528_v45 }
 0x280   :  { %v1647_v33 = vmul.f32 %v2112_v26, %v1646_v25  ;;  %v1537_v58 = vsel %vm3432_vm5, %v1536_v16, %v1532_v23  ;;  %v1126_v57 = vmul.f32 1.442695, %v1080_v2  ;;  %v1670_v17 = vand.u32 2147483648, %v3445_v30  ;;  %vm3502_vm5 = vmor %vm1289_vm14, %vm1290_vm3 }
 0x281   :  { %v1722_v63 = vsel %vm1676_vm8, %v1402_v52, %v1690_v50  ;;  %v1547_v1 = vsel %vm1546_vm0, %v2106_v44, %v1543_v29  ;;  %v1287_v10 = vmul.f32 %v3448_v27, %v1286_v15  ;;  %v1699_v48 = vsub.f32 1.0, %v1537_v58 }
 0x282   :  { %v2116_v49 = vpop.eup %2115  ;;  %v1882_v0 = vpack.c.bf16 %v1722_v63, %v3421_v24  ;;  %v1552_v13 = vsel %vm3438_vm9, %v1551_v53, %v1547_v1  ;;  %v1648_v42 = vadd.f32 %v2112_v26, %v1647_v33  ;;  %vm1654_vm4 = vcmp.eq.f32.partialorder %v1653_v31, 8.507059e+37 }
 0x283   :  { %v1700_v5 = vsub.f32 1.0, %v1552_v13  ;;  %v1288_v43 = vadd.f32 %v3448_v27, %v1287_v10  ;;  %v1660_v35 = vmul.f32 %v2116_v49, %v3445_v30  ;;  %v1731_v55 = vsel %vm1676_vm8, %v1537_v58, %v1699_v48 }
 0x284   :  { %1934 = vst [vmem:[%s3550_s5 + $0x30] sm:$0xff] %v1882_v0   ;;  %v1652_v7 = vsel %vm3479_vm2, %v2112_v26, %v1648_v42  ;;  %v2118_v38 = vpop.eup %2117  ;;  %vm3506_vm6 = vcmp.eq.f32.partialorder %v1293_v62, 8.507059e+37  ;;  %vm1665_vm7 = vweird.f32 %v2116_v49  ;;  %v1296_v37 = vor.u32 1.1754944e-38, %v1295_v56 }
 0x285   :  { %v1732_v24 = vsel %vm1676_vm8, %v1552_v13, %v1700_v5  ;;  %v1661_v12 = vsub.f32 1.0, %v1660_v35  ;;  %v1657_v60 = vsel %vm1654_vm4, %v1656_v54, %v1652_v7  ;;  %v1292_v2 = vsel %vm3502_vm5, %v3448_v27, %v1288_v43 }
 0x286   :  { %v1907_v51 = vpack.c.bf16 %v1732_v24, %v1731_v55  ;;  %v1300_v9 = vmul.f32 %v2118_v38, %v3455_v34  ;;  %vm1664_vm9 = vweird.f32 %v3445_v30  ;;  %vm1669_vm10 = vcmp.eq.f32.partialorder %v1668_v47, 8.507059e+37 }
 0x287   :  { %v1662_v59 = vmul.f32 %v2116_v49, %v1661_v12  ;;  %2119 = vpow2.f32 %v1126_v57  ;;  %v1671_v11 = vor.u32 1.1754944e-38, %v1670_v17  ;;  %v1081_v3 = vsub.f32 0.0, %v1024_v6  ;;  %vm1666_vm11 = vmor %vm1664_vm9, %vm1665_vm7 }
 0x288   :  { %1939 = vst [vmem:[%s3550_s5 + $0x58] sm:$0xff] %v1907_v51   ;;  %v1301_v36 = vsub.f32 1.0, %v1300_v9  ;;  %v1707_v14 = vsub.f32 1.0, %v1657_v60  ;;  %v1297_v53 = vsel %vm3506_vm6, %v1296_v37, %v1292_v2  ;;  %vm1305_vm12 = vweird.f32 %v2118_v38 }
 0x289   :  { %v1663_v16 = vadd.f32 %v2116_v49, %v1662_v59  ;;  %v1310_v32 = vand.u32 2147483648, %v3455_v34  ;;  %v1308_v8 = vand.u32 2147483647, %v3455_v34  ;;  %v1128_v30 = vmul.f32 1.442695, %v1081_v3 }
 0x28a   :  { %v1302_v31 = vmul.f32 %v2118_v38, %v1301_v36  ;;  %vm1304_vm13 = vweird.f32 %v3455_v34  ;;  %v1739_v27 = vsel %vm1676_vm8, %v1657_v60, %v1707_v14  ;;  %v1683_v21 = vsub.f32 1.0, %v1297_v53 }
 0x28b   :  { %v1667_v61 = vsel %vm1666_vm11, %v2116_v49, %v1663_v16  ;;  %2121 = vpow2.f32 %v1128_v30  ;;  %vm1306_vm14 = vmor %vm1304_vm13, %vm1305_vm12  ;;  %v1311_v28 = vor.u32 1.1754944e-38, %v1310_v32  ;;  %vm1309_vm15 = vcmp.eq.f32.partialorder %v1308_v8, 8.507059e+37 }
 0x28c   :  { %v1672_v26 = vsel %vm1669_vm10, %v1671_v11, %v1667_v61  ;;  %v1303_v22 = vadd.f32 %v2118_v38, %v1302_v31  ;;  %v1715_v56 = vsel %vm1676_vm8, %v1297_v53, %v1683_v21 }
 0x28d   :  { %v1708_v20 = vsub.f32 1.0, %v1672_v26  ;;  %v2120_v62 = vpop.eup %2119 }
 0x28e   :  { %v1307_v18 = vsel %vm1306_vm14, %v2118_v38, %v1303_v22  ;;  %v1176_v4 = vadd.f32 1.0, %v2120_v62 }
 0x28f   :  { %v1740_v41 = vsel %vm1676_vm8, %v1672_v26, %v1708_v20  ;;  %v1312_v45 = vsel %vm1309_vm15, %v1311_v28, %v1307_v18 }
 0x290   :  { %v1927_v52 = vpack.c.bf16 %v1740_v41, %v1739_v27  ;;  %v1684_v25 = vsub.f32 1.0, %v1312_v45  ;;  %2123 = vrcp.f32 %v1176_v4  ;;  %v1415_v1 = vand.u32 2147483648, %v1176_v4 }
 0x291   :  { %v2122_v34 = vpop.eup %2121  ;;  %v1413_v10 = vand.u32 2147483647, %v1176_v4  ;;  %vm1409_vm1 = vweird.f32 %v1176_v4 }
 0x292   :  { %1943 = vst [vmem:[%s3550_s5 + $0x78] sm:$0xff] %v1927_v52   ;;  %v1716_v50 = vsel %vm1676_vm8, %v1312_v45, %v1684_v25  ;;  %v1177_v54 = vadd.f32 1.0, %v2122_v34  ;;  %v1416_v13 = vor.u32 1.1754944e-38, %v1415_v1 }
 0x293   :  { %v1867_v29 = vpack.c.bf16 %v1716_v50, %v1715_v56  ;;  %vm1414_vm3 = vcmp.eq.f32.partialorder %v1413_v10, 8.507059e+37 }
 0x294   :  { %2125 = vrcp.f32 %v1177_v54  ;;  %v1430_v42 = vand.u32 2147483648, %v1177_v54  ;;  %v1428_v19 = vand.u32 2147483647, %v1177_v54  ;;  %vm1424_vm5 = vweird.f32 %v1177_v54 }
 0x295   :  { %1931 = vst [vmem:[%s3550_s5 + $0x18] sm:$0xff] %v1867_v29  }
 0x296   :  { %v2124_v15 = vpop.eup %2123  ;;  %v1431_v7 = vor.u32 1.1754944e-38, %v1430_v42  ;;  %vm1429_vm7 = vcmp.eq.f32.partialorder %v1428_v19, 8.507059e+37 }
 0x297   :  { %v1405_v23 = vmul.f32 %v2124_v15, %v1176_v4  ;;  %vm1410_vm0 = vweird.f32 %v2124_v15 }
 0x298   :  { %vm1411_vm2 = vmor %vm1409_vm1, %vm1410_vm0 }
 0x299   :  { %v1406_v33 = vsub.f32 1.0, %v1405_v23 }
 0x29a   :  { %v2126_v63 = vpop.eup %2125 }
 0x29b   :  { %v1407_v58 = vmul.f32 %v2124_v15, %v1406_v33  ;;  %v1420_v46 = vmul.f32 %v2126_v63, %v1177_v54  ;;  %vm1425_vm4 = vweird.f32 %v2126_v63 }
 0x29c   :  { %vm1426_vm6 = vmor %vm1424_vm5, %vm1425_vm4 }
 0x29d   :  { %v1408_v49 = vadd.f32 %v2124_v15, %v1407_v58  ;;  %v1421_v0 = vsub.f32 1.0, %v1420_v46 }
 0x29f   :  { %v1412_v48 = vsel %vm1411_vm2, %v2124_v15, %v1408_v49  ;;  %v1422_v5 = vmul.f32 %v2126_v63, %v1421_v0 }
 0x2a0   :  { %v1417_v43 = vsel %vm1414_vm3, %v1416_v13, %v1412_v48 }
 0x2a1   :  { %v1423_v35 = vadd.f32 %v2126_v63, %v1422_v5  ;;  %v1691_v47 = vsub.f32 1.0, %v1417_v43 }
 0x2a3   :  { %v1427_v57 = vsel %vm1426_vm6, %v2126_v63, %v1423_v35  ;;  %v1723_v24 = vsel %vm1676_vm8, %v1417_v43, %v1691_v47 }
 0x2a4   :  { %v1432_v6 = vsel %vm1429_vm7, %v1431_v7, %v1427_v57 }
 0x2a5   :  { %v1692_v55 = vsub.f32 1.0, %v1432_v6 }
 0x2a7   :  { %v1724_v12 = vsel %vm1676_vm8, %v1432_v6, %v1692_v55 }
 0x2a8   :  { %v1887_v17 = vpack.c.bf16 %v1724_v12, %v1723_v24 }
 0x2aa   :  { %1935 = vst [vmem:[%s3550_s5 + $0x38] sm:$0xff] %v1887_v17  }

</bundles_post_ra>
